<compile_context>
chip_gen: v7x
topology: tpu7x:2x2x1
jax: 0.10.0
libtpu: 0.0.40
codegen_flags: <defaults>
</compile_context>

<pallas_src>
import functools
import math

import jax
import jax.numpy as jnp
from jax.experimental import pallas as pl
from jax.experimental.pallas import tpu as pltpu

BN_EPS = 1e-5
VMEM_LIMIT = 32 * 1024 * 1024  # safe on v5e/v6e (128 MiB) and v7x (64 MiB physical)


# ---------------------------------------------------------------------------
# Pallas kernels
# ---------------------------------------------------------------------------
def _conv_stats_kernel(x_ref, w_ref, y_ref, stats_ref, *, wo, ho):
    """3x3 VALID conv (kw pre-folded into channels) + masked per-block BN partials.

    x_ref:     (1, H*Wp, 3*Cin) bf16  row-flattened, width-padded, kw-concatenated image
    w_ref:     (3, 3*Cin, Cout) bf16  conv weight, leading index = kh
    y_ref:     (1, RB, Wp, Cout) bf16 raw conv output row-block (cols >= Wo are garbage)
    stats_ref: (1, 1, 8, Cout)  f32   rows 0/1 = [sum, sum-of-squares] over valid positions
    """
    _, rb, wp, cout = y_ref.shape
    lp = rb * wp
    j = pl.program_id(1)                      # row-block index within the image
    base = j * lp

    acc = jnp.zeros((lp, cout), jnp.float32)
    for kh in range(3):                       # statically unrolled: 3 MXU matmuls, K = 3*Cin
        start = pl.multiple_of(base + kh * wp, 8)
        patch = x_ref[0, pl.ds(start, lp), :]               # (lp, 3*Cin) bf16
        acc = acc + jnp.dot(patch, w_ref[kh], preferred_element_type=jnp.float32)

    acc3 = acc.reshape(rb, wp, cout)
    y_ref[0] = acc3.astype(y_ref.dtype)                      # bf16 intermediate

    # In-kernel validity mask: column < Wo (row-wrap / width-pad) and row < Ho (tail guard).
    col = jax.lax.broadcasted_iota(jnp.int32, (rb, wp, 1), 1)
    row = jax.lax.broadcasted_iota(jnp.int32, (rb, wp, 1), 0) + j * rb
    mask = ((col < wo) & (row < ho)).astype(jnp.float32)

    masked = (acc3 * mask).reshape(lp, cout)                 # mask*acc
    ssum = jnp.sum(masked, axis=0, keepdims=True)            # (1, Cout)
    ssq = jnp.sum(masked * acc, axis=0, keepdims=True)       # mask*acc^2  -> (1, Cout)
    stats_ref[0, 0] = jnp.concatenate(
        [ssum, ssq, jnp.zeros((6, cout), jnp.float32)], axis=0)   # full (8, Cout) store


def _bn_relu_kernel(y_ref, scale_ref, shift_ref, o_ref):
    """Fused normalize + affine + ReLU: out = max(y*scale + shift, 0); drops pad cols."""
    wo = o_ref.shape[2]
    y = y_ref[0, :, :wo, :].astype(jnp.float32)              # (RB, Wo, Cout)
    o_ref[0] = jnp.maximum(
        y * scale_ref[...] + shift_ref[...], 0.0).astype(o_ref.dtype)


# ---------------------------------------------------------------------------
# Wrappers
# ---------------------------------------------------------------------------
def _round_up(x, m):
    return (x + m - 1) // m * m


def _pick_row_block(ho, wp, *, target_rows=128, max_rows=1024):
    """Divisor of Ho giving >=2 row blocks per image when possible, ~target matmul M."""
    divs = [d for d in range(1, ho + 1) if ho % d == 0]

    def score(d):
        rows = d * wp
        return (ho // d >= 2, rows <= max_rows, -abs(rows - target_rows))

    return max(divs, key=score)


def conv3x3_bn_relu(x_nhwc, w_hwio, gamma, beta, *, out_dtype=jnp.float32):
    """conv3x3(VALID, no bias) -> BatchNorm(batch stats) -> ReLU.  NHWC in/out."""
    n, h, w, cin = x_nhwc.shape
    cout = w_hwio.shape[-1]
    ho, wo = h - 2, w - 2
    wp = _round_up(w, 8)                      # padded row width -> 8-aligned in-kernel slices
    rb = _pick_row_block(ho, wp)              # output rows per grid step (divides Ho)
    nrb = ho // rb
    hwp = h * wp

    # ---- wrapper glue: width-pad, flatten, kw partial-im2col -> (N, H*Wp, 3*Cin) bf16 ----
    xw = x_nhwc if wp == w else jnp.pad(x_nhwc, ((0, 0), (0, 0), (0, wp - w), (0, 0)))
    xf = xw.reshape(n, hwp, cin)
    xf = jnp.pad(xf, ((0, 0), (0, 2), (0, 0)))     # 2 trailing rows feed only masked positions
    x3 = jnp.concatenate(
        [xf[:, 0:hwp], xf[:, 1:hwp + 1], xf[:, 2:hwp + 2]], axis=-1).astype(jnp.bfloat16)
    w3 = w_hwio.reshape(3, 3 * cin, cout).astype(jnp.bfloat16)

    # ---- pass 1: conv (3 matmuls, K=3*Cin) + per-row-block BN partial sums ----
    conv_kernel = functools.partial(_conv_stats_kernel, wo=wo, ho=ho)
    y, stats = pl.pallas_call(
        conv_kernel,
        grid=(n, nrb),
        in_specs=[
            pl.BlockSpec((1, hwp, 3 * cin), lambda i, j: (i, 0, 0)),   # image resident per i
            pl.BlockSpec((3, 3 * cin, cout), lambda i, j: (0, 0, 0)),  # VMEM-resident weight
        ],
        out_specs=(
            pl.BlockSpec((1, rb, wp, cout), lambda i, j: (i, j, 0, 0)),
            pl.BlockSpec((1, 1, 8, cout), lambda i, j: (i, j, 0, 0)),
        ),
        out_shape=(
            jax.ShapeDtypeStruct((n, ho, wp, cout), jnp.bfloat16),
            jax.ShapeDtypeStruct((n, nrb, 8, cout), jnp.float32),
        ),
        compiler_params=pltpu.CompilerParams(
            dimension_semantics=("parallel", "parallel"),
            vmem_limit_bytes=VMEM_LIMIT,
        ),
    )(x3, w3)

    # ---- tiny glue: fold full-batch BN stats + affine into (scale, shift) ----
    count = float(n * ho * wo)                # BN reduces over the FULL (N, Ho, Wo)
    ssum = jnp.sum(stats[:, :, 0, :], axis=(0, 1))
    ssq = jnp.sum(stats[:, :, 1, :], axis=(0, 1))
    mean = ssum / count
    var = jnp.maximum(ssq / count - mean * mean, 0.0)   # biased variance, cancellation-clamped
    scale = gamma * jax.lax.rsqrt(var + BN_EPS)
    shift = beta - mean * scale

    # ---- pass 2: lane-dense normalize + affine + ReLU, writes final layout directly ----
    out = pl.pallas_call(
        _bn_relu_kernel,
        grid=(n, nrb),
        in_specs=[
            pl.BlockSpec((1, rb, wp, cout), lambda i, j: (i, j, 0, 0)),
            pl.BlockSpec((1, cout), lambda i, j: (0, 0)),
            pl.BlockSpec((1, cout), lambda i, j: (0, 0)),
        ],
        out_specs=pl.BlockSpec((1, rb, wo, cout), lambda i, j: (i, j, 0, 0)),
        out_shape=jax.ShapeDtypeStruct((n, ho, wo, cout), out_dtype),
        compiler_params=pltpu.CompilerParams(
            dimension_semantics=("parallel", "parallel"),
            vmem_limit_bytes=VMEM_LIMIT,
        ),
    )(y, scale.reshape(1, cout).astype(jnp.float32),
      shift.reshape(1, cout).astype(jnp.float32))
    return out


def unet_bottleneck(x_nchw, params):
    """Forward of uNetBottleneck: conv1->bn1->relu->conv2->bn2->relu (NCHW in/out)."""
    x = jnp.transpose(x_nchw, (0, 2, 3, 1)).astype(jnp.float32)   # NCHW -> NHWC
    # Stage-1 output stored bf16: it is the bf16 MXU operand of stage 2 anyway.
    y = conv3x3_bn_relu(x, params["w1"], params["g1"], params["b1"],
                        out_dtype=jnp.bfloat16)
    y = conv3x3_bn_relu(y, params["w2"], params["g2"], params["b2"],
                        out_dtype=jnp.float32)
    return jnp.transpose(y, (0, 3, 1, 2))                         # NHWC -> NCHW


# ---------------------------------------------------------------------------
# Pure-JAX reference
# ---------------------------------------------------------------------------
def reference_forward(x_nchw, params, *, matmul_dtype=jnp.float32):
    """Reference.  matmul_dtype=bf16 mirrors the kernel's deliberate bf16 MXU feed."""
    x = jnp.transpose(x_nchw, (0, 2, 3, 1)).astype(jnp.float32)

    def stage(x, w, g, b):
        y = jax.lax.conv_general_dilated(
            x.astype(matmul_dtype), w.astype(matmul_dtype),
            window_strides=(1, 1), padding="VALID",
            dimension_numbers=("NHWC", "HWIO", "NHWC"),
            preferred_element_type=jnp.float32)
        mean = jnp.mean(y, axis=(0, 1, 2), keepdims=True)
        var = jnp.mean(jnp.square(y - mean), axis=(0, 1, 2), keepdims=True)
        y = (y - mean) * jax.lax.rsqrt(var + BN_EPS) * g + b
        return jnp.maximum(y, 0.0)

    y = stage(x, params["w1"], params["g1"], params["b1"])
    y = stage(y, params["w2"], params["g2"], params["b2"])
    return jnp.transpose(y, (0, 3, 1, 2))


# ---------------------------------------------------------------------------
if __name__ == "__main__":
    depth_level = 1
    cin = int(64 * math.pow(2, depth_level - 1))    # 64
    cout = int(64 * math.pow(2, depth_level))       # 128
    n, hh, ww = 2, 16, 16

    key = jax.random.PRNGKey(0)
    k_x, k_w1, k_w2, k_g1, k_b1, k_g2, k_b2 = jax.random.split(key, 7)

    # Input follows PyTorch NCHW convention; conv weights in HWIO; BN affine params.
    x = jax.random.normal(k_x, (n, cin, hh, ww), jnp.float32)
    params = {
        "w1": jax.random.normal(k_w1, (3, 3, cin, cout), jnp.float32) / math.sqrt(9 * cin),
        "g1": 1.0 + 0.1 * jax.random.normal(k_g1, (cout,), jnp.float32),
        "b1": 0.1 * jax.random.normal(k_b1, (cout,), jnp.float32),
        "w2": jax.random.normal(k_w2, (3, 3, cout, cout), jnp.float32) / math.sqrt(9 * cout),
        "g2": 1.0 + 0.1 * jax.random.normal(k_g2, (cout,), jnp.float32),
        "b2": 0.1 * jax.random.normal(k_b2, (cout,), jnp.float32),
    }

    out = jax.jit(unet_bottleneck)(x, params)
    jax.block_until_ready(out)
    assert out.shape == (n, cout, hh - 4, ww - 4)

    # Check vs a reference with the same bf16 matmul-operand quantization (validates the
    # kernel logic; slack covers the bf16 storage of the intermediate conv output).
    ref_bf16 = reference_forward(x, params, matmul_dtype=jnp.bfloat16)
    assert jnp.allclose(out, ref_bf16, atol=5e-2, rtol=5e-2), "mismatch vs bf16-matched ref"

    # Looser check against the full-f32 module semantics (bounds the deliberate
    # bf16 quantization error of the MXU operands / intermediates).
    ref_f32 = reference_forward(x, params, matmul_dtype=jnp.float32)
    assert jnp.allclose(out, ref_f32, atol=2e-1, rtol=1e-1), "mismatch vs f32 ref"

    print("KERNEL_OK")
</pallas_src>

<mosaic_0001>
module attributes {stable_mosaic.version = 11 : i64} {
  func.func @_conv_stats_kernel(%arg0: i32, %arg1: i32, %arg2: memref<1x256x192xbf16, #tpu.memory_space<vmem>>, %arg3: memref<3x192x128xbf16, #tpu.memory_space<vmem>>, %arg4: memref<1x7x16x128xbf16, #tpu.memory_space<vmem>>, %arg5: memref<1x1x8x128xf32, #tpu.memory_space<vmem>>) attributes {dimension_semantics = [#tpu.dimension_semantics<parallel>, #tpu.dimension_semantics<parallel>], iteration_bounds = array<i64: 2, 2>, scalar_prefetch = 0 : i64, scratch_operands = 0 : i64, tpu.core_type = #tpu.core_type<tc>, window_params = [{transform_indices = @transform_0, window_bounds = array<i64: 1, 256, 192>}, {pipeline_mode = #tpu.pipeline_mode<synchronous>, transform_indices = @transform_1, window_bounds = array<i64: 3, 192, 128>}, {transform_indices = @transform_2, window_bounds = array<i64: 1, 7, 16, 128>}, {transform_indices = @transform_3, window_bounds = array<i64: 1, 1, 8, 128>}]} {
    %c112_i32 = arith.constant 112 : i32
    %0 = arith.muli %arg1, %c112_i32 : i32
    %cst = arith.constant 0.000000e+00 : f32
    %1 = vector.broadcast %cst : f32 to vector<112x128xf32>
    %c0_i32 = arith.constant 0 : i32
    %2 = arith.addi %0, %c0_i32 : i32
    %3 = tpu.assume_multiple %2, 8 : i32
    %c0 = arith.constant 0 : index
    %4 = arith.index_cast %3 : i32 to index
    %c0_0 = arith.constant 0 : index
    %5 = vector.load %arg2[%c0, %4, %c0_0] : memref<1x256x192xbf16, #tpu.memory_space<vmem>>, vector<1x112x192xbf16>
    %6 = vector.shape_cast %5 : vector<1x112x192xbf16> to vector<112x192xbf16>
    %c0_1 = arith.constant 0 : index
    %c0_2 = arith.constant 0 : index
    %c0_3 = arith.constant 0 : index
    %7 = vector.load %arg3[%c0_1, %c0_2, %c0_3] : memref<3x192x128xbf16, #tpu.memory_space<vmem>>, vector<1x192x128xbf16>
    %8 = vector.shape_cast %7 : vector<1x192x128xbf16> to vector<192x128xbf16>
    %cst_4 = arith.constant dense<0.000000e+00> : vector<112x128xf32>
    %9 = tpu.matmul %6, %8, %cst_4 {dimension_numbers = #tpu.dot_dimension_numbers<[1], [0], [0], [1], [0, 0, 1, 1], [], []>} : vector<112x192xbf16>, vector<192x128xbf16>, vector<112x128xf32> -> vector<112x128xf32>
    %10 = arith.addf %1, %9 : vector<112x128xf32>
    %c16_i32 = arith.constant 16 : i32
    %11 = arith.addi %0, %c16_i32 : i32
    %12 = tpu.assume_multiple %11, 8 : i32
    %c0_5 = arith.constant 0 : index
    %13 = arith.index_cast %12 : i32 to index
    %c0_6 = arith.constant 0 : index
    %14 = vector.load %arg2[%c0_5, %13, %c0_6] : memref<1x256x192xbf16, #tpu.memory_space<vmem>>, vector<1x112x192xbf16>
    %15 = vector.shape_cast %14 : vector<1x112x192xbf16> to vector<112x192xbf16>
    %c1 = arith.constant 1 : index
    %c0_7 = arith.constant 0 : index
    %c0_8 = arith.constant 0 : index
    %16 = vector.load %arg3[%c1, %c0_7, %c0_8] : memref<3x192x128xbf16, #tpu.memory_space<vmem>>, vector<1x192x128xbf16>
    %17 = vector.shape_cast %16 : vector<1x192x128xbf16> to vector<192x128xbf16>
    %cst_9 = arith.constant dense<0.000000e+00> : vector<112x128xf32>
    %18 = tpu.matmul %15, %17, %cst_9 {dimension_numbers = #tpu.dot_dimension_numbers<[1], [0], [0], [1], [0, 0, 1, 1], [], []>} : vector<112x192xbf16>, vector<192x128xbf16>, vector<112x128xf32> -> vector<112x128xf32>
    %19 = arith.addf %10, %18 : vector<112x128xf32>
    %c32_i32 = arith.constant 32 : i32
    %20 = arith.addi %0, %c32_i32 : i32
    %21 = tpu.assume_multiple %20, 8 : i32
    %c0_10 = arith.constant 0 : index
    %22 = arith.index_cast %21 : i32 to index
    %c0_11 = arith.constant 0 : index
    %23 = vector.load %arg2[%c0_10, %22, %c0_11] : memref<1x256x192xbf16, #tpu.memory_space<vmem>>, vector<1x112x192xbf16>
    %24 = vector.shape_cast %23 : vector<1x112x192xbf16> to vector<112x192xbf16>
    %c2 = arith.constant 2 : index
    %c0_12 = arith.constant 0 : index
    %c0_13 = arith.constant 0 : index
    %25 = vector.load %arg3[%c2, %c0_12, %c0_13] : memref<3x192x128xbf16, #tpu.memory_space<vmem>>, vector<1x192x128xbf16>
    %26 = vector.shape_cast %25 : vector<1x192x128xbf16> to vector<192x128xbf16>
    %cst_14 = arith.constant dense<0.000000e+00> : vector<112x128xf32>
    %27 = tpu.matmul %24, %26, %cst_14 {dimension_numbers = #tpu.dot_dimension_numbers<[1], [0], [0], [1], [0, 0, 1, 1], [], []>} : vector<112x192xbf16>, vector<192x128xbf16>, vector<112x128xf32> -> vector<112x128xf32>
    %28 = arith.addf %19, %27 : vector<112x128xf32>
    %29 = vector.shape_cast %28 : vector<112x128xf32> to vector<7x16x128xf32>
    %30 = arith.truncf %29 : vector<7x16x128xf32> to vector<7x16x128xbf16>
    %c0_15 = arith.constant 0 : index
    %c0_16 = arith.constant 0 : index
    %c0_17 = arith.constant 0 : index
    %c0_18 = arith.constant 0 : index
    %31 = vector.load %arg4[%c0_15, %c0_16, %c0_17, %c0_18] : memref<1x7x16x128xbf16, #tpu.memory_space<vmem>>, vector<1x7x16x128xbf16>
    %32 = vector.shape_cast %31 : vector<1x7x16x128xbf16> to vector<7x16x128xbf16>
    %33 = vector.shape_cast %30 : vector<7x16x128xbf16> to vector<1x7x16x128xbf16>
    tpu.vector_store %arg4[%c0_15, %c0_16, %c0_17, %c0_18], %33 {strides = array<i32>} : memref<1x7x16x128xbf16, #tpu.memory_space<vmem>>, vector<1x7x16x128xbf16>,
    %34 = tpu.iota {dimensions = array<i32: 1>} : vector<7x16x1xi32>
    %35 = tpu.iota {dimensions = array<i32: 0>} : vector<7x16x1xi32>
    %c7_i32 = arith.constant 7 : i32
    %36 = arith.muli %arg1, %c7_i32 : i32
    %37 = vector.broadcast %36 : i32 to vector<7x16x1xi32>
    %38 = arith.addi %35, %37 : vector<7x16x1xi32>
    %c14_i32 = arith.constant 14 : i32
    %39 = vector.broadcast %c14_i32 : i32 to vector<7x16x1xi32>
    %40 = arith.cmpi slt, %34, %39 : vector<7x16x1xi32>
    %c14_i32_19 = arith.constant 14 : i32
    %41 = vector.broadcast %c14_i32_19 : i32 to vector<7x16x1xi32>
    %42 = arith.cmpi slt, %38, %41 : vector<7x16x1xi32>
    %43 = arith.andi %40, %42 : vector<7x16x1xi1>
    %44 = arith.extui %43 : vector<7x16x1xi1> to vector<7x16x1xi32>
    %45 = arith.sitofp %44 : vector<7x16x1xi32> to vector<7x16x1xf32>
    %46 = vector.broadcast %45 : vector<7x16x1xf32> to vector<7x16x128xf32>
    %47 = arith.mulf %29, %46 : vector<7x16x128xf32>
    %48 = vector.shape_cast %47 : vector<7x16x128xf32> to vector<112x128xf32>
    %cst_20 = arith.constant dense<0.000000e+00> : vector<128xf32>
    %49 = vector.multi_reduction <add>, %48, %cst_20 [0] : vector<112x128xf32> to vector<128xf32>
    %50 = vector.shape_cast %49 : vector<128xf32> to vector<1x128xf32>
    %51 = arith.mulf %48, %28 : vector<112x128xf32>
    %cst_21 = arith.constant dense<0.000000e+00> : vector<128xf32>
    %52 = vector.multi_reduction <add>, %51, %cst_21 [0] : vector<112x128xf32> to vector<128xf32>
    %53 = vector.shape_cast %52 : vector<128xf32> to vector<1x128xf32>
    %cst_22 = arith.constant 0.000000e+00 : f32
    %54 = vector.broadcast %cst_22 : f32 to vector<6x128xf32>
    %55 = tpu.concatenate %50, %53, %54 in 0 : vector<1x128xf32>, vector<1x128xf32>, vector<6x128xf32> -> vector<8x128xf32>
    %c0_23 = arith.constant 0 : index
    %c0_24 = arith.constant 0 : index
    %c0_25 = arith.constant 0 : index
    %c0_26 = arith.constant 0 : index
    %56 = vector.load %arg5[%c0_23, %c0_24, %c0_25, %c0_26] : memref<1x1x8x128xf32, #tpu.memory_space<vmem>>, vector<1x1x8x128xf32>
    %57 = vector.shape_cast %56 : vector<1x1x8x128xf32> to vector<8x128xf32>
    %58 = vector.shape_cast %55 : vector<8x128xf32> to vector<1x1x8x128xf32>
    tpu.vector_store %arg5[%c0_23, %c0_24, %c0_25, %c0_26], %58 {strides = array<i32>} : memref<1x1x8x128xf32, #tpu.memory_space<vmem>>, vector<1x1x8x128xf32>,
    return
  }
  func.func @transform_0(%arg0: i32, %arg1: i32) -> (i32, i32, i32) {
    %c0_i32 = arith.constant 0 : i32
    %c0_i32_0 = arith.constant 0 : i32
    %c0_i32_1 = arith.constant 0 : i32
    return %arg0, %c0_i32, %c0_i32_0 : i32, i32, i32
  }
  func.func @transform_1(%arg0: i32, %arg1: i32) -> (i32, i32, i32) {
    %c0_i32 = arith.constant 0 : i32
    %c0_i32_0 = arith.constant 0 : i32
    %c0_i32_1 = arith.constant 0 : i32
    %c0_i32_2 = arith.constant 0 : i32
    return %c0_i32, %c0_i32_0, %c0_i32_1 : i32, i32, i32
  }
  func.func @transform_2(%arg0: i32, %arg1: i32) -> (i32, i32, i32, i32) {
    %c0_i32 = arith.constant 0 : i32
    %c0_i32_0 = arith.constant 0 : i32
    %c0_i32_1 = arith.constant 0 : i32
    return %arg0, %arg1, %c0_i32, %c0_i32_0 : i32, i32, i32, i32
  }
  func.func @transform_3(%arg0: i32, %arg1: i32) -> (i32, i32, i32, i32) {
    %c0_i32 = arith.constant 0 : i32
    %c0_i32_0 = arith.constant 0 : i32
    %c0_i32_1 = arith.constant 0 : i32
    return %arg0, %arg1, %c0_i32, %c0_i32_0 : i32, i32, i32, i32
  }
}

module attributes {stable_mosaic.version = 11 : i64} {
  func.func @_bn_relu_kernel(%arg0: i32, %arg1: i32, %arg2: memref<1x7x16x128xbf16, #tpu.memory_space<vmem>>, %arg3: memref<1x128xf32, #tpu.memory_space<vmem>>, %arg4: memref<1x128xf32, #tpu.memory_space<vmem>>, %arg5: memref<1x7x14x128xbf16, #tpu.memory_space<vmem>>) attributes {dimension_semantics = [#tpu.dimension_semantics<parallel>, #tpu.dimension_semantics<parallel>], iteration_bounds = array<i64: 2, 2>, scalar_prefetch = 0 : i64, scratch_operands = 0 : i64, tpu.core_type = #tpu.core_type<tc>, window_params = [{transform_indices = @transform_0, window_bounds = array<i64: 1, 7, 16, 128>}, {pipeline_mode = #tpu.pipeline_mode<synchronous>, transform_indices = @transform_1, window_bounds = array<i64: 1, 128>}, {pipeline_mode = #tpu.pipeline_mode<synchronous>, transform_indices = @transform_2, window_bounds = array<i64: 1, 128>}, {transform_indices = @transform_3, window_bounds = array<i64: 1, 7, 14, 128>}]} {
    %c0 = arith.constant 0 : index
    %c0_0 = arith.constant 0 : index
    %c0_1 = arith.constant 0 : index
    %c0_2 = arith.constant 0 : index
    %0 = vector.load %arg2[%c0, %c0_0, %c0_1, %c0_2] : memref<1x7x16x128xbf16, #tpu.memory_space<vmem>>, vector<1x7x14x128xbf16>
    %1 = vector.shape_cast %0 : vector<1x7x14x128xbf16> to vector<7x14x128xbf16>
    %2 = arith.extf %1 : vector<7x14x128xbf16> to vector<7x14x128xf32>
    %c0_3 = arith.constant 0 : index
    %c0_4 = arith.constant 0 : index
    %3 = vector.load %arg3[%c0_3, %c0_4] : memref<1x128xf32, #tpu.memory_space<vmem>>, vector<1x128xf32>
    %4 = vector.shape_cast %3 : vector<1x128xf32> to vector<1x1x128xf32>
    %5 = vector.broadcast %4 : vector<1x1x128xf32> to vector<7x14x128xf32>
    %6 = arith.mulf %2, %5 : vector<7x14x128xf32>
    %c0_5 = arith.constant 0 : index
    %c0_6 = arith.constant 0 : index
    %7 = vector.load %arg4[%c0_5, %c0_6] : memref<1x128xf32, #tpu.memory_space<vmem>>, vector<1x128xf32>
    %8 = vector.shape_cast %7 : vector<1x128xf32> to vector<1x1x128xf32>
    %9 = vector.broadcast %8 : vector<1x1x128xf32> to vector<7x14x128xf32>
    %10 = arith.addf %6, %9 : vector<7x14x128xf32>
    %cst = arith.constant 0.000000e+00 : f32
    %11 = vector.broadcast %cst : f32 to vector<7x14x128xf32>
    %12 = arith.maximumf %10, %11 : vector<7x14x128xf32>
    %13 = arith.truncf %12 : vector<7x14x128xf32> to vector<7x14x128xbf16>
    %c0_7 = arith.constant 0 : index
    %c0_8 = arith.constant 0 : index
    %c0_9 = arith.constant 0 : index
    %c0_10 = arith.constant 0 : index
    %14 = vector.load %arg5[%c0_7, %c0_8, %c0_9, %c0_10] : memref<1x7x14x128xbf16, #tpu.memory_space<vmem>>, vector<1x7x14x128xbf16>
    %15 = vector.shape_cast %14 : vector<1x7x14x128xbf16> to vector<7x14x128xbf16>
    %16 = vector.shape_cast %13 : vector<7x14x128xbf16> to vector<1x7x14x128xbf16>
    tpu.vector_store %arg5[%c0_7, %c0_8, %c0_9, %c0_10], %16 {strides = array<i32>} : memref<1x7x14x128xbf16, #tpu.memory_space<vmem>>, vector<1x7x14x128xbf16>,
    return
  }
  func.func @transform_0(%arg0: i32, %arg1: i32) -> (i32, i32, i32, i32) {
    %c0_i32 = arith.constant 0 : i32
    %c0_i32_0 = arith.constant 0 : i32
    %c0_i32_1 = arith.constant 0 : i32
    return %arg0, %arg1, %c0_i32, %c0_i32_0 : i32, i32, i32, i32
  }
  func.func @transform_1(%arg0: i32, %arg1: i32) -> (i32, i32) {
    %c0_i32 = arith.constant 0 : i32
    %c0_i32_0 = arith.constant 0 : i32
    %c0_i32_1 = arith.constant 0 : i32
    return %c0_i32, %c0_i32_0 : i32, i32
  }
  func.func @transform_2(%arg0: i32, %arg1: i32) -> (i32, i32) {
    %c0_i32 = arith.constant 0 : i32
    %c0_i32_0 = arith.constant 0 : i32
    %c0_i32_1 = arith.constant 0 : i32
    return %c0_i32, %c0_i32_0 : i32, i32
  }
  func.func @transform_3(%arg0: i32, %arg1: i32) -> (i32, i32, i32, i32) {
    %c0_i32 = arith.constant 0 : i32
    %c0_i32_0 = arith.constant 0 : i32
    %c0_i32_1 = arith.constant 0 : i32
    return %arg0, %arg1, %c0_i32, %c0_i32_0 : i32, i32, i32, i32
  }
}

module attributes {stable_mosaic.version = 11 : i64} {
  func.func @_conv_stats_kernel(%arg0: i32, %arg1: i32, %arg2: memref<1x224x384xbf16, #tpu.memory_space<vmem>>, %arg3: memref<3x384x128xbf16, #tpu.memory_space<vmem>>, %arg4: memref<1x6x16x128xbf16, #tpu.memory_space<vmem>>, %arg5: memref<1x1x8x128xf32, #tpu.memory_space<vmem>>) attributes {dimension_semantics = [#tpu.dimension_semantics<parallel>, #tpu.dimension_semantics<parallel>], iteration_bounds = array<i64: 2, 2>, scalar_prefetch = 0 : i64, scratch_operands = 0 : i64, tpu.core_type = #tpu.core_type<tc>, window_params = [{transform_indices = @transform_0, window_bounds = array<i64: 1, 224, 384>}, {pipeline_mode = #tpu.pipeline_mode<synchronous>, transform_indices = @transform_1, window_bounds = array<i64: 3, 384, 128>}, {transform_indices = @transform_2, window_bounds = array<i64: 1, 6, 16, 128>}, {transform_indices = @transform_3, window_bounds = array<i64: 1, 1, 8, 128>}]} {
    %c96_i32 = arith.constant 96 : i32
    %0 = arith.muli %arg1, %c96_i32 : i32
    %cst = arith.constant 0.000000e+00 : f32
    %1 = vector.broadcast %cst : f32 to vector<96x128xf32>
    %c0_i32 = arith.constant 0 : i32
    %2 = arith.addi %0, %c0_i32 : i32
    %3 = tpu.assume_multiple %2, 8 : i32
    %c0 = arith.constant 0 : index
    %4 = arith.index_cast %3 : i32 to index
    %c0_0 = arith.constant 0 : index
    %5 = vector.load %arg2[%c0, %4, %c0_0] : memref<1x224x384xbf16, #tpu.memory_space<vmem>>, vector<1x96x384xbf16>
    %6 = vector.shape_cast %5 : vector<1x96x384xbf16> to vector<96x384xbf16>
    %c0_1 = arith.constant 0 : index
    %c0_2 = arith.constant 0 : index
    %c0_3 = arith.constant 0 : index
    %7 = vector.load %arg3[%c0_1, %c0_2, %c0_3] : memref<3x384x128xbf16, #tpu.memory_space<vmem>>, vector<1x384x128xbf16>
    %8 = vector.shape_cast %7 : vector<1x384x128xbf16> to vector<384x128xbf16>
    %cst_4 = arith.constant dense<0.000000e+00> : vector<96x128xf32>
    %9 = tpu.matmul %6, %8, %cst_4 {dimension_numbers = #tpu.dot_dimension_numbers<[1], [0], [0], [1], [0, 0, 1, 1], [], []>} : vector<96x384xbf16>, vector<384x128xbf16>, vector<96x128xf32> -> vector<96x128xf32>
    %10 = arith.addf %1, %9 : vector<96x128xf32>
    %c16_i32 = arith.constant 16 : i32
    %11 = arith.addi %0, %c16_i32 : i32
    %12 = tpu.assume_multiple %11, 8 : i32
    %c0_5 = arith.constant 0 : index
    %13 = arith.index_cast %12 : i32 to index
    %c0_6 = arith.constant 0 : index
    %14 = vector.load %arg2[%c0_5, %13, %c0_6] : memref<1x224x384xbf16, #tpu.memory_space<vmem>>, vector<1x96x384xbf16>
    %15 = vector.shape_cast %14 : vector<1x96x384xbf16> to vector<96x384xbf16>
    %c1 = arith.constant 1 : index
    %c0_7 = arith.constant 0 : index
    %c0_8 = arith.constant 0 : index
    %16 = vector.load %arg3[%c1, %c0_7, %c0_8] : memref<3x384x128xbf16, #tpu.memory_space<vmem>>, vector<1x384x128xbf16>
    %17 = vector.shape_cast %16 : vector<1x384x128xbf16> to vector<384x128xbf16>
    %cst_9 = arith.constant dense<0.000000e+00> : vector<96x128xf32>
    %18 = tpu.matmul %15, %17, %cst_9 {dimension_numbers = #tpu.dot_dimension_numbers<[1], [0], [0], [1], [0, 0, 1, 1], [], []>} : vector<96x384xbf16>, vector<384x128xbf16>, vector<96x128xf32> -> vector<96x128xf32>
    %19 = arith.addf %10, %18 : vector<96x128xf32>
    %c32_i32 = arith.constant 32 : i32
    %20 = arith.addi %0, %c32_i32 : i32
    %21 = tpu.assume_multiple %20, 8 : i32
    %c0_10 = arith.constant 0 : index
    %22 = arith.index_cast %21 : i32 to index
    %c0_11 = arith.constant 0 : index
    %23 = vector.load %arg2[%c0_10, %22, %c0_11] : memref<1x224x384xbf16, #tpu.memory_space<vmem>>, vector<1x96x384xbf16>
    %24 = vector.shape_cast %23 : vector<1x96x384xbf16> to vector<96x384xbf16>
    %c2 = arith.constant 2 : index
    %c0_12 = arith.constant 0 : index
    %c0_13 = arith.constant 0 : index
    %25 = vector.load %arg3[%c2, %c0_12, %c0_13] : memref<3x384x128xbf16, #tpu.memory_space<vmem>>, vector<1x384x128xbf16>
    %26 = vector.shape_cast %25 : vector<1x384x128xbf16> to vector<384x128xbf16>
    %cst_14 = arith.constant dense<0.000000e+00> : vector<96x128xf32>
    %27 = tpu.matmul %24, %26, %cst_14 {dimension_numbers = #tpu.dot_dimension_numbers<[1], [0], [0], [1], [0, 0, 1, 1], [], []>} : vector<96x384xbf16>, vector<384x128xbf16>, vector<96x128xf32> -> vector<96x128xf32>
    %28 = arith.addf %19, %27 : vector<96x128xf32>
    %29 = vector.shape_cast %28 : vector<96x128xf32> to vector<6x16x128xf32>
    %30 = arith.truncf %29 : vector<6x16x128xf32> to vector<6x16x128xbf16>
    %c0_15 = arith.constant 0 : index
    %c0_16 = arith.constant 0 : index
    %c0_17 = arith.constant 0 : index
    %c0_18 = arith.constant 0 : index
    %31 = vector.load %arg4[%c0_15, %c0_16, %c0_17, %c0_18] : memref<1x6x16x128xbf16, #tpu.memory_space<vmem>>, vector<1x6x16x128xbf16>
    %32 = vector.shape_cast %31 : vector<1x6x16x128xbf16> to vector<6x16x128xbf16>
    %33 = vector.shape_cast %30 : vector<6x16x128xbf16> to vector<1x6x16x128xbf16>
    tpu.vector_store %arg4[%c0_15, %c0_16, %c0_17, %c0_18], %33 {strides = array<i32>} : memref<1x6x16x128xbf16, #tpu.memory_space<vmem>>, vector<1x6x16x128xbf16>,
    %34 = tpu.iota {dimensions = array<i32: 1>} : vector<6x16x1xi32>
    %35 = tpu.iota {dimensions = array<i32: 0>} : vector<6x16x1xi32>
    %c6_i32 = arith.constant 6 : i32
    %36 = arith.muli %arg1, %c6_i32 : i32
    %37 = vector.broadcast %36 : i32 to vector<6x16x1xi32>
    %38 = arith.addi %35, %37 : vector<6x16x1xi32>
    %c12_i32 = arith.constant 12 : i32
    %39 = vector.broadcast %c12_i32 : i32 to vector<6x16x1xi32>
    %40 = arith.cmpi slt, %34, %39 : vector<6x16x1xi32>
    %c12_i32_19 = arith.constant 12 : i32
    %41 = vector.broadcast %c12_i32_19 : i32 to vector<6x16x1xi32>
    %42 = arith.cmpi slt, %38, %41 : vector<6x16x1xi32>
    %43 = arith.andi %40, %42 : vector<6x16x1xi1>
    %44 = arith.extui %43 : vector<6x16x1xi1> to vector<6x16x1xi32>
    %45 = arith.sitofp %44 : vector<6x16x1xi32> to vector<6x16x1xf32>
    %46 = vector.broadcast %45 : vector<6x16x1xf32> to vector<6x16x128xf32>
    %47 = arith.mulf %29, %46 : vector<6x16x128xf32>
    %48 = vector.shape_cast %47 : vector<6x16x128xf32> to vector<96x128xf32>
    %cst_20 = arith.constant dense<0.000000e+00> : vector<128xf32>
    %49 = vector.multi_reduction <add>, %48, %cst_20 [0] : vector<96x128xf32> to vector<128xf32>
    %50 = vector.shape_cast %49 : vector<128xf32> to vector<1x128xf32>
    %51 = arith.mulf %48, %28 : vector<96x128xf32>
    %cst_21 = arith.constant dense<0.000000e+00> : vector<128xf32>
    %52 = vector.multi_reduction <add>, %51, %cst_21 [0] : vector<96x128xf32> to vector<128xf32>
    %53 = vector.shape_cast %52 : vector<128xf32> to vector<1x128xf32>
    %cst_22 = arith.constant 0.000000e+00 : f32
    %54 = vector.broadcast %cst_22 : f32 to vector<6x128xf32>
    %55 = tpu.concatenate %50, %53, %54 in 0 : vector<1x128xf32>, vector<1x128xf32>, vector<6x128xf32> -> vector<8x128xf32>
    %c0_23 = arith.constant 0 : index
    %c0_24 = arith.constant 0 : index
    %c0_25 = arith.constant 0 : index
    %c0_26 = arith.constant 0 : index
    %56 = vector.load %arg5[%c0_23, %c0_24, %c0_25, %c0_26] : memref<1x1x8x128xf32, #tpu.memory_space<vmem>>, vector<1x1x8x128xf32>
    %57 = vector.shape_cast %56 : vector<1x1x8x128xf32> to vector<8x128xf32>
    %58 = vector.shape_cast %55 : vector<8x128xf32> to vector<1x1x8x128xf32>
    tpu.vector_store %arg5[%c0_23, %c0_24, %c0_25, %c0_26], %58 {strides = array<i32>} : memref<1x1x8x128xf32, #tpu.memory_space<vmem>>, vector<1x1x8x128xf32>,
    return
  }
  func.func @transform_0(%arg0: i32, %arg1: i32) -> (i32, i32, i32) {
    %c0_i32 = arith.constant 0 : i32
    %c0_i32_0 = arith.constant 0 : i32
    %c0_i32_1 = arith.constant 0 : i32
    return %arg0, %c0_i32, %c0_i32_0 : i32, i32, i32
  }
  func.func @transform_1(%arg0: i32, %arg1: i32) -> (i32, i32, i32) {
    %c0_i32 = arith.constant 0 : i32
    %c0_i32_0 = arith.constant 0 : i32
    %c0_i32_1 = arith.constant 0 : i32
    %c0_i32_2 = arith.constant 0 : i32
    return %c0_i32, %c0_i32_0, %c0_i32_1 : i32, i32, i32
  }
  func.func @transform_2(%arg0: i32, %arg1: i32) -> (i32, i32, i32, i32) {
    %c0_i32 = arith.constant 0 : i32
    %c0_i32_0 = arith.constant 0 : i32
    %c0_i32_1 = arith.constant 0 : i32
    return %arg0, %arg1, %c0_i32, %c0_i32_0 : i32, i32, i32, i32
  }
  func.func @transform_3(%arg0: i32, %arg1: i32) -> (i32, i32, i32, i32) {
    %c0_i32 = arith.constant 0 : i32
    %c0_i32_0 = arith.constant 0 : i32
    %c0_i32_1 = arith.constant 0 : i32
    return %arg0, %arg1, %c0_i32, %c0_i32_0 : i32, i32, i32, i32
  }
}

module attributes {stable_mosaic.version = 11 : i64} {
  func.func @_bn_relu_kernel(%arg0: i32, %arg1: i32, %arg2: memref<1x6x16x128xbf16, #tpu.memory_space<vmem>>, %arg3: memref<1x128xf32, #tpu.memory_space<vmem>>, %arg4: memref<1x128xf32, #tpu.memory_space<vmem>>, %arg5: memref<1x6x12x128xf32, #tpu.memory_space<vmem>>) attributes {dimension_semantics = [#tpu.dimension_semantics<parallel>, #tpu.dimension_semantics<parallel>], iteration_bounds = array<i64: 2, 2>, scalar_prefetch = 0 : i64, scratch_operands = 0 : i64, tpu.core_type = #tpu.core_type<tc>, window_params = [{transform_indices = @transform_0, window_bounds = array<i64: 1, 6, 16, 128>}, {pipeline_mode = #tpu.pipeline_mode<synchronous>, transform_indices = @transform_1, window_bounds = array<i64: 1, 128>}, {pipeline_mode = #tpu.pipeline_mode<synchronous>, transform_indices = @transform_2, window_bounds = array<i64: 1, 128>}, {transform_indices = @transform_3, window_bounds = array<i64: 1, 6, 12, 128>}]} {
    %c0 = arith.constant 0 : index
    %c0_0 = arith.constant 0 : index
    %c0_1 = arith.constant 0 : index
    %c0_2 = arith.constant 0 : index
    %0 = vector.load %arg2[%c0, %c0_0, %c0_1, %c0_2] : memref<1x6x16x128xbf16, #tpu.memory_space<vmem>>, vector<1x6x12x128xbf16>
    %1 = vector.shape_cast %0 : vector<1x6x12x128xbf16> to vector<6x12x128xbf16>
    %2 = arith.extf %1 : vector<6x12x128xbf16> to vector<6x12x128xf32>
    %c0_3 = arith.constant 0 : index
    %c0_4 = arith.constant 0 : index
    %3 = vector.load %arg3[%c0_3, %c0_4] : memref<1x128xf32, #tpu.memory_space<vmem>>, vector<1x128xf32>
    %4 = vector.shape_cast %3 : vector<1x128xf32> to vector<1x1x128xf32>
    %5 = vector.broadcast %4 : vector<1x1x128xf32> to vector<6x12x128xf32>
    %6 = arith.mulf %2, %5 : vector<6x12x128xf32>
    %c0_5 = arith.constant 0 : index
    %c0_6 = arith.constant 0 : index
    %7 = vector.load %arg4[%c0_5, %c0_6] : memref<1x128xf32, #tpu.memory_space<vmem>>, vector<1x128xf32>
    %8 = vector.shape_cast %7 : vector<1x128xf32> to vector<1x1x128xf32>
    %9 = vector.broadcast %8 : vector<1x1x128xf32> to vector<6x12x128xf32>
    %10 = arith.addf %6, %9 : vector<6x12x128xf32>
    %cst = arith.constant 0.000000e+00 : f32
    %11 = vector.broadcast %cst : f32 to vector<6x12x128xf32>
    %12 = arith.maximumf %10, %11 : vector<6x12x128xf32>
    %c0_7 = arith.constant 0 : index
    %c0_8 = arith.constant 0 : index
    %c0_9 = arith.constant 0 : index
    %c0_10 = arith.constant 0 : index
    %13 = vector.load %arg5[%c0_7, %c0_8, %c0_9, %c0_10] : memref<1x6x12x128xf32, #tpu.memory_space<vmem>>, vector<1x6x12x128xf32>
    %14 = vector.shape_cast %13 : vector<1x6x12x128xf32> to vector<6x12x128xf32>
    %15 = vector.shape_cast %12 : vector<6x12x128xf32> to vector<1x6x12x128xf32>
    tpu.vector_store %arg5[%c0_7, %c0_8, %c0_9, %c0_10], %15 {strides = array<i32>} : memref<1x6x12x128xf32, #tpu.memory_space<vmem>>, vector<1x6x12x128xf32>,
    return
  }
  func.func @transform_0(%arg0: i32, %arg1: i32) -> (i32, i32, i32, i32) {
    %c0_i32 = arith.constant 0 : i32
    %c0_i32_0 = arith.constant 0 : i32
    %c0_i32_1 = arith.constant 0 : i32
    return %arg0, %arg1, %c0_i32, %c0_i32_0 : i32, i32, i32, i32
  }
  func.func @transform_1(%arg0: i32, %arg1: i32) -> (i32, i32) {
    %c0_i32 = arith.constant 0 : i32
    %c0_i32_0 = arith.constant 0 : i32
    %c0_i32_1 = arith.constant 0 : i32
    return %c0_i32, %c0_i32_0 : i32, i32
  }
  func.func @transform_2(%arg0: i32, %arg1: i32) -> (i32, i32) {
    %c0_i32 = arith.constant 0 : i32
    %c0_i32_0 = arith.constant 0 : i32
    %c0_i32_1 = arith.constant 0 : i32
    return %c0_i32, %c0_i32_0 : i32, i32
  }
  func.func @transform_3(%arg0: i32, %arg1: i32) -> (i32, i32, i32, i32) {
    %c0_i32 = arith.constant 0 : i32
    %c0_i32_0 = arith.constant 0 : i32
    %c0_i32_1 = arith.constant 0 : i32
    return %arg0, %arg1, %c0_i32, %c0_i32_0 : i32, i32, i32, i32
  }
}

</mosaic_0001>

<bundles_post_ra>
// kernel: unet_bottleneck.5
= control target key start
LH: loop header
LB: loop body
LE: loop exit
PB: predicated region body
PF: predicated region fallthrough
CT: control target
= control target key end

     0   :  { %s610_s12 = smov 0   ;;  %s612_s13 = smov 0   ;;  %s735_s0 = inlined_call_operand.vmem [shape: bf16[2,14,16,128], index: 0, kind: input, shape index: {}]   ;;  %s736_s1 = inlined_call_operand.vmem [shape: f32[1,128], index: 1, kind: input, shape index: {}]   ;;  %s737_s2 = inlined_call_operand.vmem [shape: f32[1,128], index: 2, kind: input, shape index: {}]   ;;  %s738_s3 = inlined_call_operand.vmem [shape: bf16[2,14,14,128], index: 3, kind: output, shape index: {}]  }
   0x1   :  { %s614_s14 = smov 0   ;;  %s616_s15 = smov 0  }
   0x2   :  { %s618_s16 = smov 0  }
   0x3 LB: > { %s22_s17 = sadd.s32 1, %s580_s14  ;;  %s25_s18 = sadd.s32 1, %s584_s15  ;;  %s588_s16 = sphi %s618_s16, %s13_s16   ;;  %s584_s15 = sphi %s616_s15, %s742_s15   ;;  %s580_s14 = sphi %s614_s14, %s741_s14   ;;  %s576_s13 = sphi %s612_s13, %s740_s13   ;;  %s572_s12 = sphi %s610_s12, %s739_s12  }
   0x4   : > { %p23_p0 = scmp.ge.s32.totalorder %s22_s17, 2  ;;  %p472_p1 = scmp.ge.s32.totalorder %s588_s16, 1 }
   0x5   : > { %p159_p2 = scmp.lt.s32.totalorder %s588_s16, 5 }
   0x6   : > { %s744_s17 = smov (%p23_p0, %s22_s17), 0  ;;  %s746_s18 = smov (!%p23_p0, %s25_s18), %s584_s15 }
   0x7   : > { %p160_p3 = pnand %p472_p1, %p159_p2  ;;  %p27_p4 = scmp.ge.s32.totalorder %s746_s18, 2 }
   0x8   : > { %s193_s19 = smul.u32 (!%p160_p3), 7, %s572_s12  ;;  %p194_p5 = scmp.lt.s32.totalorder (!%p160_p3), %s576_s13, 1  ;;  %v653_v0 = vld [vmem:[%s736_s1] ss:$0 sm:$0xff] (!%p160_p3) }
   0x9   : > { %s748_s18 = smov (%p27_p4, %s746_s18), 0  ;;  %163 = sbr.rel (%p160_p3) target bundleno = 46 (0x2e), region = 32 }
   0xa   : > { %p196_p6 = scmp.lt.s32.totalorder (!%p160_p3), %s193_s19, 13  ;;  %v664_v11 = vld [vmem:[%s737_s2] ss:$0 sm:$0xff] (!%p160_p3) }
  0x10   : > { %s750_s13 = smov (!%p194_p5, %s576_s13), 1  ;;  %s752_s19 = smov (!%p196_p6, %s193_s19), 13 }
  0x11   : > { %s509_s20 = smul.u32 28, %s750_s13  ;;  %s473_s21 = sshll.u32 %s752_s19, 1 }
  0x13   : > { %s640_s22 = sadd.s32 %s509_s20, %s473_s21 }
  0x14   : > { %s474_s23 = sshll.u32 %s640_s22, 2 }
  0x15   : > { %s648_s26 = scalar_lea.vmem %s735_s0, %s474_s23  ;;  %s689_s6 = scalar_lea.vmem %s738_s3, %s474_s23 }
  0x16   : > { %v215_v1 = vld [vmem:[%s648_s26] ss:$8 sps:$4 sm:$0xff]   ;;  %v216_v2 = vld [vmem:[%s648_s26 + $0x4] sm:$0x7]  ;;  %v218_v3 = vld [vmem:[%s648_s26 + $0xc] sm:$0x7] }
  0x17   : > { %v229_v4 = vunpack.c.l.bf16 %v215_v1  ;;  %v230_v5 = vunpack.c.l.bf16 %v216_v2  ;;  %v231_v6 = vunpack.c.h.bf16 %v215_v1  ;;  %v232_v7 = vunpack.c.l.bf16 %v218_v3  ;;  %v219_v8 = vld [vmem:[%s648_s26 + $0x10] ss:$8 sps:$4 sm:$0xff]   ;;  %v220_v9 = vld [vmem:[%s648_s26 + $0x14] sm:$0x7]  ;;  %v222_v10 = vld [vmem:[%s648_s26 + $0x1c] sm:$0x7] }
  0x18   : > { %v233_v12 = vunpack.c.l.bf16 %v219_v8  ;;  %v234_v13 = vunpack.c.l.bf16 %v220_v9  ;;  %v235_v14 = vunpack.c.h.bf16 %v219_v8  ;;  %v236_v15 = vunpack.c.l.bf16 %v222_v10  ;;  %v223_v32 = vld [vmem:[%s648_s26 + $0x20] ss:$8 sps:$4 sm:$0xff]   ;;  %v224_v37 = vld [vmem:[%s648_s26 + $0x24] sm:$0x7]  ;;  %v226_v42 = vld [vmem:[%s648_s26 + $0x2c] sm:$0x7] }
  0x19   : > { %v250_v16 = vmul.f32 %v653_v0, %v229_v4  ;;  %v251_v17 = vmul.f32 %v653_v0, %v230_v5  ;;  %v252_v18 = vmul.f32 %v653_v0, %v231_v6  ;;  %v253_v19 = vmul.f32 %v653_v0, %v232_v7  ;;  %v227_v47 = vld [vmem:[%s648_s26 + $0x30] sm:$0xf]  ;;  %v228_v48 = vld [vmem:[%s648_s26 + $0x34] sm:$0x7] }
  0x1a   : > { %v254_v20 = vmul.f32 %v653_v0, %v233_v12  ;;  %v255_v21 = vmul.f32 %v653_v0, %v234_v13  ;;  %v256_v22 = vmul.f32 %v653_v0, %v235_v14  ;;  %v257_v23 = vmul.f32 %v653_v0, %v236_v15 }
  0x1b   : > { %v271_v24 = vadd.f32 %v664_v11, %v250_v16  ;;  %v272_v25 = vadd.f32 %v664_v11, %v251_v17  ;;  %v273_v26 = vadd.f32 %v664_v11, %v252_v18  ;;  %v274_v27 = vadd.f32 %v664_v11, %v253_v19 }
  0x1c   : > { %v275_v28 = vadd.f32 %v664_v11, %v254_v20  ;;  %v276_v29 = vadd.f32 %v664_v11, %v255_v21  ;;  %v277_v30 = vadd.f32 %v664_v11, %v256_v22  ;;  %v278_v31 = vadd.f32 %v664_v11, %v257_v23 }
  0x1d   : > { %v285_v33 = vmax.f32 %v271_v24, 0.0  ;;  %v286_v34 = vmax.f32 %v272_v25, 0.0  ;;  %v287_v35 = vmax.f32 %v273_v26, 0.0  ;;  %v288_v36 = vmax.f32 %v274_v27, 0.0 }
  0x1e   : > { %v289_v38 = vmax.f32 %v275_v28, 0.0  ;;  %v290_v39 = vmax.f32 %v276_v29, 0.0  ;;  %v291_v40 = vmax.f32 %v277_v30, 0.0  ;;  %v292_v41 = vmax.f32 %v278_v31, 0.0 }
  0x1f   : > { %v495_v43 = vpack.c.bf16 %v285_v33, %v285_v33  ;;  %v496_v44 = vpack.c.bf16 %v286_v34, %v286_v34  ;;  %v497_v45 = vpack.c.bf16 %v287_v35, %v287_v35  ;;  %v498_v46 = vpack.c.bf16 %v288_v36, %v288_v36 }
  0x20   : > { %v499_v49 = vpack.c.bf16 %v289_v38, %v289_v38  ;;  %v500_v50 = vpack.c.bf16 %v290_v39, %v290_v39  ;;  %v501_v51 = vpack.c.bf16 %v291_v40, %v291_v40  ;;  %v502_v52 = vpack.c.bf16 %v292_v41, %v292_v41 }
  0x21   : > { %355 = vst [vmem:[%s689_s6] sm:$0xf] %v495_v43  ;;  %356 = vst [vmem:[%s689_s6 + $0x4] sm:$0x7] %v496_v44  ;;  %v237_v53 = vunpack.c.l.bf16 %v223_v32  ;;  %v238_v54 = vunpack.c.l.bf16 %v224_v37  ;;  %v239_v55 = vunpack.c.h.bf16 %v223_v32  ;;  %v240_v56 = vunpack.c.l.bf16 %v226_v42 }
  0x22   : > { %357 = vst [vmem:[%s689_s6 + $0x8] sm:$0xf] %v497_v45  ;;  %358 = vst [vmem:[%s689_s6 + $0xc] sm:$0x7] %v498_v46  ;;  %v241_v57 = vunpack.c.l.bf16 %v227_v47  ;;  %v242_v58 = vunpack.c.l.bf16 %v228_v48 }
  0x23   : > { %359 = vst [vmem:[%s689_s6 + $0x10] sm:$0xf] %v499_v49  ;;  %360 = vst [vmem:[%s689_s6 + $0x14] sm:$0x7] %v500_v50  ;;  %v258_v59 = vmul.f32 %v653_v0, %v237_v53  ;;  %v259_v60 = vmul.f32 %v653_v0, %v238_v54  ;;  %v260_v61 = vmul.f32 %v653_v0, %v239_v55 }
  0x24   : > { %361 = vst [vmem:[%s689_s6 + $0x18] sm:$0xf] %v501_v51  ;;  %362 = vst [vmem:[%s689_s6 + $0x1c] sm:$0x7] %v502_v52  ;;  %v261_v62 = vmul.f32 %v653_v0, %v240_v56  ;;  %v262_v63 = vmul.f32 %v653_v0, %v241_v57  ;;  %v263_v1 = vmul.f32 %v653_v0, %v242_v58 }
  0x25   : > { %v279_v2 = vadd.f32 %v664_v11, %v258_v59  ;;  %v280_v3 = vadd.f32 %v664_v11, %v259_v60  ;;  %v281_v4 = vadd.f32 %v664_v11, %v260_v61 }
  0x26   : > { %v282_v5 = vadd.f32 %v664_v11, %v261_v62  ;;  %v283_v6 = vadd.f32 %v664_v11, %v262_v63  ;;  %v284_v7 = vadd.f32 %v664_v11, %v263_v1 }
  0x27   : > { %v293_v8 = vmax.f32 %v279_v2, 0.0  ;;  %v294_v9 = vmax.f32 %v280_v3, 0.0  ;;  %v295_v0 = vmax.f32 %v281_v4, 0.0 }
  0x28   : > { %v296_v10 = vmax.f32 %v282_v5, 0.0  ;;  %v297_v12 = vmax.f32 %v283_v6, 0.0  ;;  %v298_v13 = vmax.f32 %v284_v7, 0.0 }
  0x29   : > { %v503_v14 = vpack.c.bf16 %v293_v8, %v293_v8  ;;  %v504_v15 = vpack.c.bf16 %v294_v9, %v294_v9  ;;  %v505_v16 = vpack.c.bf16 %v295_v0, %v295_v0 }
  0x2a   : > { %v506_v17 = vpack.c.bf16 %v296_v10, %v296_v10  ;;  %v507_v18 = vpack.c.bf16 %v297_v12, %v297_v12  ;;  %v508_v19 = vpack.c.bf16 %v298_v13, %v298_v13 }
  0x2b   : > { %363 = vst [vmem:[%s689_s6 + $0x20] sm:$0xf] %v503_v14  ;;  %364 = vst [vmem:[%s689_s6 + $0x24] sm:$0x7] %v504_v15 }
  0x2c   : > { %365 = vst [vmem:[%s689_s6 + $0x28] sm:$0xf] %v505_v16  ;;  %366 = vst [vmem:[%s689_s6 + $0x2c] sm:$0x7] %v506_v17 }
  0x2d   : > { %367 = vst [vmem:[%s689_s6 + $0x30] sm:$0xf] %v507_v18  ;;  %368 = vst [vmem:[%s689_s6 + $0x34] sm:$0x7] %v508_v19 }
  0x2e PF: > { %s13_s16 = sadd.s32 1, %s588_s16   ;;  %s739_s12 = smov %s580_s14 }
  0x2f   : > { %p10_p7 = scmp.ge.s32.totalorder %s13_s16, 6   ;;  %s740_s13 = smov %s584_s15 }
  0x30   : > { %s741_s14 = smov %s744_s17  ;;  %s742_s15 = smov %s748_s18 }
  0x31   :  { %12 = sbr.rel (!%p10_p7) target bundleno = 3 (0x3), region = 62 }

// kernel: unet_bottleneck.4
= control target key start
LH: loop header
LB: loop body
LE: loop exit
PB: predicated region body
PF: predicated region fallthrough
CT: control target
= control target key end

     0   :  { %s1965_s12 = smov 0   ;;  %s1967_s13 = smov 0   ;;  %s2381_s0 = inlined_call_operand.vmem [shape: bf16[2,256,192], index: 0, kind: input, shape index: {}]   ;;  %s2382_s1 = inlined_call_operand.vmem [shape: bf16[3,192,128], index: 1, kind: input, shape index: {}]   ;;  %s2383_s2 = inlined_call_operand.vmem [shape: bf16[2,14,16,128], index: 2, kind: output, shape index: {0}]   ;;  %s2384_s3 = inlined_call_operand.vmem [shape: f32[2,2,8,128], index: 3, kind: output, shape index: {1}]  }
   0x1   :  { %s1969_s14 = smov 0   ;;  %s1971_s15 = smov 0  }
   0x2   :  { %s1973_s16 = smov 0  }
   0x3 LB: > { %s23_s17 = sadd.s32 1, %s1933_s14  ;;  %s26_s18 = sadd.s32 1, %s1937_s15  ;;  %s1941_s16 = sphi %s1973_s16, %s14_s16   ;;  %s1937_s15 = sphi %s1971_s15, %s2388_s15   ;;  %s1933_s14 = sphi %s1969_s14, %s2387_s14   ;;  %s1929_s13 = sphi %s1967_s13, %s2386_s13   ;;  %s1925_s12 = sphi %s1965_s12, %s2385_s12  }
   0x4   : > { %p24_p0 = scmp.ge.s32.totalorder %s23_s17, 2  ;;  %p1452_p1 = scmp.ge.s32.totalorder %s1941_s16, 1 }
   0x5   : > { %p156_p2 = scmp.lt.s32.totalorder %s1941_s16, 5 }
   0x6   : > { %s2390_s17 = smov (%p24_p0, %s23_s17), 0  ;;  %s2392_s18 = smov (!%p24_p0, %s26_s18), %s1937_s15 }
   0x7   : > { %p157_p3 = pnand %p1452_p1, %p156_p2  ;;  %p28_p4 = scmp.ge.s32.totalorder %s2392_s18, 2 }
   0x8   : > { %v1804_v0 = vld [vmem:[%s2382_s1 + $0x60] sm:$0xff] (!%p157_p3)   ;;  %v1943_v1 = vmov (!%p157_p3), 0   ;;  %v1806_v3 = vld [vmem:[%s2382_s1 + $0x68] sm:$0xff] (!%p157_p3)   ;;  %v1808_v5 = vld [vmem:[%s2382_s1 + $0x70] sm:$0xff] (!%p157_p3)   ;;  %p193_p5 = scmp.lt.s32.totalorder (!%p157_p3), %s1929_s13, 1  ;;  %s2025_s4 = smul.u32 (!%p157_p3), 112, %s1925_s12 }
   0x9   : > { %s2394_s18 = smov (%p28_p4, %s2392_s18), 0  ;;  %160 = sbr.rel (%p157_p3) target bundleno = 388 (0x184), region = 28 }
   0xa   : > { %464 = vmatprep.subr.bf16.mxu1 (!%p157_p3), %v1943_v1  ;;  %709 = vmatprep.subr.bf16.mxu0 (!%p157_p3), %v1943_v1  ;;  %v1805_v2 = vld [vmem:[%s2382_s1] sm:$0xff] (!%p157_p3)   ;;  %v1807_v4 = vld [vmem:[%s2382_s1 + $0x8] sm:$0xff] (!%p157_p3)   ;;  %v1809_v6 = vld [vmem:[%s2382_s1 + $0x10] sm:$0xff] (!%p157_p3)   ;;  %s262_s9 = sadd.s32 (!%p157_p3), 16, %s2025_s4  ;;  %s219_s23 = sshra.s32 (!%p157_p3), %s2025_s4, 3  ;;  %vm442_vm0 = vcmask (!%p157_p3), 523264  }
   0xb   : > { %465 = vmatpush1.bf16.msra.mxu1 (!%p157_p3), %v1804_v0  ;;  %710 = vmatpush1.bf16.msra.mxu0 (!%p157_p3), %v1805_v2  ;;  %v1810_v7 = vld [vmem:[%s2382_s1 + $0x78] sm:$0xff] (!%p157_p3)   ;;  %v1812_v9 = vld [vmem:[%s2382_s1 + $0x80] sm:$0xff] (!%p157_p3)   ;;  %s263_s22 = sshra.s32 (!%p157_p3), %s262_s9, 3  ;;  %v1814_v11 = vld [vmem:[%s2382_s1 + $0x88] sm:$0xff] (!%p157_p3)   ;;  %s1643_s6 = sshll.u32 (!%p157_p3), %s219_s23, 3 }
   0xc   : > { %466 = vmatprep.subr.bf16.mxu1 (!%p157_p3), %v1943_v1  ;;  %711 = vmatprep.subr.bf16.mxu0 (!%p157_p3), %v1943_v1  ;;  %v1811_v8 = vld [vmem:[%s2382_s1 + $0x18] sm:$0xff] (!%p157_p3)   ;;  %v1813_v10 = vld [vmem:[%s2382_s1 + $0x20] sm:$0xff] (!%p157_p3)   ;;  %v1815_v12 = vld [vmem:[%s2382_s1 + $0x28] sm:$0xff] (!%p157_p3)   ;;  %s1644_s5 = sshll.u32 (!%p157_p3), %s263_s22, 3  ;;  %s798_s24 = sadd.s32 (!%p157_p3), 32, %s2025_s4 }
   0xd   : > { %v1816_v13 = vld [vmem:[%s2382_s1 + $0x90] sm:$0xff] (!%p157_p3)   ;;  %v1818_v16 = vld [vmem:[%s2382_s1 + $0x98] sm:$0xff] (!%p157_p3)   ;;  %v1820_v19 = vld [vmem:[%s2382_s1 + $0xa0] sm:$0xff] (!%p157_p3)   ;;  %s799_s27 = sshra.s32 (!%p157_p3), %s798_s24, 3  ;;  %p211_p7 = scmp.lt.s32.totalorder (!%p157_p3), %s1925_s12, 1 }
   0xe   : > { %v1817_v14 = vld [vmem:[%s2382_s1 + $0x30] sm:$0xff] (!%p157_p3)   ;;  %v1819_v18 = vld [vmem:[%s2382_s1 + $0x38] sm:$0xff] (!%p157_p3)   ;;  %v1821_v20 = vld [vmem:[%s2382_s1 + $0x40] sm:$0xff] (!%p157_p3)   ;;  %s1645_s4 = sshll.u32 (!%p157_p3), %s799_s27, 3 }
   0xf   : > { %467 = vmatpush1.bf16.msra.mxu1 (!%p157_p3), %v1806_v3  ;;  %712 = vmatpush1.bf16.msra.mxu0 (!%p157_p3), %v1807_v4  ;;  %v1822_v21 = vld [vmem:[%s2382_s1 + $0xa8] sm:$0xff] (!%p157_p3)   ;;  %v1824_v23 = vld [vmem:[%s2382_s1 + $0xb0] sm:$0xff] (!%p157_p3)   ;;  %v1826_v25 = vld [vmem:[%s2382_s1 + $0xb8] sm:$0xff] (!%p157_p3)  }
  0x10   : > { %468 = vmatprep.subr.bf16.mxu1 %v1943_v1  ;;  %713 = vmatprep.subr.bf16.mxu0 %v1943_v1  ;;  %s2396_s13 = smov (!%p193_p5, %s1929_s13), 1  ;;  %v1823_v22 = vld [vmem:[%s2382_s1 + $0x48] sm:$0xff]   ;;  %v1825_v24 = vld [vmem:[%s2382_s1 + $0x50] sm:$0xff]   ;;  %v1827_v26 = vld [vmem:[%s2382_s1 + $0x58] sm:$0xff]  }
  0x11   : > { %s1642_s21 = sshll.u32 %s2396_s13, 8  ;;  %v1834_v29 = vld [vmem:[%s2382_s1 + $0xc0] sm:$0xff]   ;;  %v1835_v32 = vld [vmem:[%s2382_s1 + $0xc8] sm:$0xff]   ;;  %v1842_v36 = vld [vmem:[%s2382_s1 + $0xd0] sm:$0xff]   ;;  %s1457_s23 = sshll.u32 %s2396_s13, 1 }
  0x12   : > { %s2059_s30 = scalar_lea.vmem %s2381_s0, %s1642_s21  ;;  %v1847_v38 = vld [vmem:[%s2382_s1 + $0xd8] sm:$0xff]   ;;  %v1850_v42 = vld [vmem:[%s2382_s1 + $0xe0] sm:$0xff]   ;;  %v1857_v44 = vld [vmem:[%s2382_s1 + $0xe8] sm:$0xff]  }
  0x13   : > { %469 = vmatpush1.bf16.msra.mxu1 %v1808_v5  ;;  %714 = vmatpush1.bf16.msra.mxu0 %v1809_v6  ;;  %s2066_s9 = scalar_lea.vmem %s2059_s30, %s1644_s5  ;;  %s2073_s19 = scalar_lea.vmem %s2059_s30, %s1643_s6  ;;  %v1858_v48 = vld [vmem:[%s2382_s1 + $0xf0] sm:$0xff]   ;;  %v1865_v50 = vld [vmem:[%s2382_s1 + $0xf8] sm:$0xff]   ;;  %v1870_v55 = vld [vmem:[%s2382_s1 + $0x100] sm:$0xff]  }
  0x14   : > { %470 = vmatprep.subr.bf16.mxu1 %v1943_v1  ;;  %715 = vmatprep.subr.bf16.mxu0 %v1943_v1  ;;  %v1830_v15 = vld [vmem:[%s2066_s9 + $0x4] ss:$8 sps:$4 sm:$0xff]   ;;  %v1828_v27 = vld [vmem:[%s2066_s9] ss:$8 sps:$4 sm:$0xff]   ;;  %v1836_v30 = vld [vmem:[%s2066_s9 + $0x14] ss:$8 sps:$4 sm:$0xff]   ;;  %s2138_s5 = scalar_lea.vmem %s2059_s30, %s1645_s4 }
  0x15   : > { %v1833_v17 = vld [vmem:[%s2073_s19 + $0x4] ss:$8 sps:$4 sm:$0xff]   ;;  %1513 = vmatprep.mubr.msk.bf16.mxu1 %vm442_vm0, %v1830_v15  ;;  %v1831_v28 = vld [vmem:[%s2073_s19] ss:$8 sps:$4 sm:$0xff]   ;;  %v1838_v31 = vld [vmem:[%s2073_s19 + $0x14] ss:$8 sps:$4 sm:$0xff]  }
  0x16   : > { %1546 = vmatprep.mubr.msk.bf16.mxu0 %vm442_vm0, %v1833_v17  ;;  %v1840_v33 = vld [vmem:[%s2066_s9 + $0x10] ss:$8 sps:$4 sm:$0xff]   ;;  %v1843_v35 = vld [vmem:[%s2066_s9 + $0x24] ss:$8 sps:$4 sm:$0xff]   ;;  %v1848_v39 = vld [vmem:[%s2066_s9 + $0x20] ss:$8 sps:$4 sm:$0xff]  }
  0x17   : > { %471 = vmatpush1.bf16.msra.mxu1 %v1810_v7  ;;  %716 = vmatpush1.bf16.msra.mxu0 %v1811_v8  ;;  %v1841_v34 = vld [vmem:[%s2073_s19 + $0x10] ss:$8 sps:$4 sm:$0xff]   ;;  %v1845_v37 = vld [vmem:[%s2073_s19 + $0x24] ss:$8 sps:$4 sm:$0xff]   ;;  %v1849_v40 = vld [vmem:[%s2073_s19 + $0x20] ss:$8 sps:$4 sm:$0xff]  }
  0x18   : > { %472 = vmatprep.subr.bf16.mxu1 %v1943_v1  ;;  %717 = vmatprep.subr.bf16.mxu0 %v1943_v1  ;;  %v1851_v41 = vld [vmem:[%s2066_s9 + $0x34] ss:$8 sps:$4 sm:$0xff]   ;;  %v1855_v45 = vld [vmem:[%s2066_s9 + $0x30] ss:$8 sps:$4 sm:$0xff]   ;;  %v1859_v47 = vld [vmem:[%s2066_s9 + $0x44] ss:$8 sps:$4 sm:$0xff]  }
  0x19   : > { %v1853_v43 = vld [vmem:[%s2073_s19 + $0x34] ss:$8 sps:$4 sm:$0xff]   ;;  %v1856_v46 = vld [vmem:[%s2073_s19 + $0x30] ss:$8 sps:$4 sm:$0xff]   ;;  %v1861_v49 = vld [vmem:[%s2073_s19 + $0x44] ss:$8 sps:$4 sm:$0xff]  }
  0x1a   : > { %v1863_v51 = vld [vmem:[%s2066_s9 + $0x40] ss:$8 sps:$4 sm:$0xff]   ;;  %v1866_v53 = vld [vmem:[%s2066_s9 + $0x54] ss:$8 sps:$4 sm:$0xff]   ;;  %v1871_v57 = vld [vmem:[%s2066_s9 + $0x50] ss:$8 sps:$4 sm:$0xff]  }
  0x1b   : > { %473 = vmatpush1.bf16.msra.mxu1 %v1812_v9  ;;  %718 = vmatpush1.bf16.msra.mxu0 %v1813_v10  ;;  %v1864_v52 = vld [vmem:[%s2073_s19 + $0x40] ss:$8 sps:$4 sm:$0xff]   ;;  %v1868_v54 = vld [vmem:[%s2073_s19 + $0x54] ss:$8 sps:$4 sm:$0xff]   ;;  %v1872_v58 = vld [vmem:[%s2073_s19 + $0x50] ss:$8 sps:$4 sm:$0xff]  }
  0x1c   : > { %474 = vmatprep.subr.bf16.mxu1 %v1943_v1  ;;  %719 = vmatprep.subr.bf16.mxu0 %v1943_v1  ;;  %v1873_v56 = vld [vmem:[%s2382_s1 + $0x108] sm:$0xff]   ;;  %v1880_v61 = vld [vmem:[%s2382_s1 + $0x110] sm:$0xff]   ;;  %v1881_v62 = vld [vmem:[%s2382_s1 + $0x118] sm:$0xff]  }
  0x1d   : > { %v1874_v59 = vld [vmem:[%s2066_s9 + $0x64] ss:$8 sps:$4 sm:$0xff]   ;;  %v1878_v63 = vld [vmem:[%s2066_s9 + $0x60] ss:$8 sps:$4 sm:$0xff]   ;;  %v1888_v6 = vld [vmem:[%s2138_s5 + $0x14] ss:$8 sps:$4 sm:$0xff]  }
  0x1e   : > { %v1876_v60 = vld [vmem:[%s2073_s19 + $0x64] ss:$8 sps:$4 sm:$0xff]   ;;  %v1879_v0 = vld [vmem:[%s2073_s19 + $0x60] ss:$8 sps:$4 sm:$0xff]   ;;  %v1893_v7 = vld [vmem:[%s2138_s5 + $0x50] ss:$8 sps:$4 sm:$0xff]  }
  0x1f   : > { %475 = vmatpush1.bf16.msra.mxu1 %v1814_v11  ;;  %720 = vmatpush1.bf16.msra.mxu0 %v1815_v12  ;;  %v1887_v2 = vld [vmem:[%s2138_s5 + $0x44] ss:$8 sps:$4 sm:$0xff]   ;;  %v1885_v4 = vld [vmem:[%s2138_s5 + $0x40] ss:$8 sps:$4 sm:$0xff]   ;;  %v1892_v8 = vld [vmem:[%s2138_s5 + $0x10] ss:$8 sps:$4 sm:$0xff]  }
  0x20   : > { %476 = vmatprep.subr.bf16.mxu1 %v1943_v1  ;;  %721 = vmatprep.subr.bf16.mxu0 %v1943_v1  ;;  %v1884_v3 = vld [vmem:[%s2138_s5 + $0x4] ss:$8 sps:$4 sm:$0xff]   ;;  %v1882_v5 = vld [vmem:[%s2138_s5] ss:$8 sps:$4 sm:$0xff]   ;;  %s198_s9 = smul.u32 7, %s1925_s12  ;;  %s2398_s12 = smov (!%p211_p7, %s1925_s12), 1 }
  0x21   : > { %v1896_v9 = vld [vmem:[%s2138_s5 + $0x64] ss:$8 sps:$4 sm:$0xff]   ;;  %v1899_v11 = vld [vmem:[%s2138_s5 + $0x60] ss:$8 sps:$4 sm:$0xff]   ;;  %s214_s24 = sadd.s32 %s1457_s23, %s2398_s12 }
  0x22   : > { %v1894_v10 = vld [vmem:[%s2138_s5 + $0x24] ss:$8 sps:$4 sm:$0xff]   ;;  %v1898_v12 = vld [vmem:[%s2138_s5 + $0x20] ss:$8 sps:$4 sm:$0xff]   ;;  %p201_p6 = scmp.lt.s32.totalorder %s198_s9, 13  ;;  %s1458_s25 = sshll.u32 %s214_s24, 3 }
  0x23   : > { %477 = vmatpush1.bf16.msra.mxu1 %v1816_v13  ;;  %722 = vmatpush1.bf16.msra.mxu0 %v1817_v14  ;;  %v1900_v13 = vld [vmem:[%s2138_s5 + $0x34] ss:$8 sps:$4 sm:$0xff]   ;;  %v1902_v14 = vld [vmem:[%s2138_s5 + $0x30] ss:$8 sps:$4 sm:$0xff]   ;;  %s216_s4 = scalar_lea.vmem %s2384_s3, %s1458_s25 }
  0x24   : > { %478 = vmatprep.subr.bf16.mxu1 %v1943_v1  ;;  %723 = vmatprep.subr.bf16.mxu0 %v1943_v1  ;;  %s202_s19 = scalar_select %p201_p6, %s198_s9, 13 }
  0x26   : > { %s1455_s8 = sshll.u32 %s202_s19, 1 }
  0x27   : > { %479 = vmatpush1.bf16.msra.mxu1 %v1818_v16  ;;  %724 = vmatpush1.bf16.msra.mxu0 %v1819_v18 }
  0x28   : > { %480 = vmatprep.subr.bf16.mxu1 %v1943_v1  ;;  %725 = vmatprep.subr.bf16.mxu0 %v1943_v1 }
  0x2b   : > { %481 = vmatpush1.bf16.msra.mxu1 %v1820_v19  ;;  %726 = vmatpush1.bf16.msra.mxu0 %v1821_v20 }
  0x2c   : > { %482 = vmatprep.subr.bf16.mxu1 %v1943_v1  ;;  %727 = vmatprep.subr.bf16.mxu0 %v1943_v1 }
  0x2f   : > { %483 = vmatpush1.bf16.msra.mxu1 %v1822_v21  ;;  %728 = vmatpush1.bf16.msra.mxu0 %v1823_v22 }
  0x30   : > { %484 = vmatprep.subr.bf16.mxu1 %v1943_v1  ;;  %729 = vmatprep.subr.bf16.mxu0 %v1943_v1 }
  0x33   : > { %485 = vmatpush1.bf16.msra.mxu1 %v1824_v23  ;;  %730 = vmatpush1.bf16.msra.mxu0 %v1825_v24 }
  0x34   : > { %486 = vmatprep.subr.bf16.mxu1 %v1943_v1  ;;  %731 = vmatprep.subr.bf16.mxu0 %v1943_v1 }
  0x37   : > { %487 = vmatpush1.bf16.msra.mxu1 %v1826_v25  ;;  %732 = vmatpush1.bf16.msra.mxu0 %v1827_v26 }
  0x38   : > { %1701 = vmatprep.subr.bf16.mxu1 %v1943_v1  ;;  %999 = vmatprep.subr.bf16.mxu0 %v1943_v1 }
  0x3a   : > { %497 = vmatmul.mubr.bf16.vlgmr.msra.gmra.mrb[0].mxu1 %v1828_v27  ;;  %742 = vmatmul.mubr.bf16.vlgmr.msra.gmra.mrb[0].mxu0 %v1831_v28 }
  0x3b   : > { %1514 = vmatprep.mubr.msk.bf16.mxu1 %vm442_vm0, %v1836_v30  ;;  %1000 = vmatpush1.bf16.msra.mxu0 %v1834_v29 }
  0x3c   : > { %1547 = vmatprep.mubr.msk.bf16.mxu0 %vm442_vm0, %v1838_v31  ;;  %1001 = vmatprep.subr.bf16.mxu0 %v1943_v1 }
  0x3d   : > { %1713 = vmatpush1.bf16.msra.mxu1 %v1834_v29 }
  0x3e   : > { %1702 = vmatprep.subr.bf16.mxu1 %v1943_v1 }
  0x3f   : > { %1002 = vmatpush1.bf16.msra.mxu0 %v1835_v32 }
  0x40   : > { %1003 = vmatprep.subr.bf16.mxu0 %v1943_v1 }
  0x41   : > { %1714 = vmatpush1.bf16.msra.mxu1 %v1835_v32 }
  0x42   : > { %505 = vmatmul.mubr.bf16.gmra.mrb[4].mxu1 %v1840_v33  ;;  %1703 = vmatprep.subr.bf16.mxu1 %v1943_v1 }
  0x43   : > { %750 = vmatmul.mubr.bf16.gmra.mrb[4].mxu0 %v1841_v34  ;;  %1515 = vmatprep.mubr.msk.bf16.mxu1 %vm442_vm0, %v1843_v35 }
  0x44   : > { %1004 = vmatpush1.bf16.msra.mxu0 %v1842_v36  ;;  %1548 = vmatprep.mubr.msk.bf16.mxu0 %vm442_vm0, %v1845_v37 }
  0x45   : > { %1005 = vmatprep.subr.bf16.mxu0 %v1943_v1  ;;  %1715 = vmatpush1.bf16.msra.mxu1 %v1842_v36 }
  0x46   : > { %1704 = vmatprep.subr.bf16.mxu1 %v1943_v1 }
  0x48   : > { %1006 = vmatpush1.bf16.msra.mxu0 %v1847_v38 }
  0x49   : > { %1007 = vmatprep.subr.bf16.mxu0 %v1943_v1  ;;  %1716 = vmatpush1.bf16.msra.mxu1 %v1847_v38 }
  0x4a   : > { %513 = vmatmul.mubr.bf16.gmra.mrb[8].mxu1 %v1848_v39  ;;  %1705 = vmatprep.subr.bf16.mxu1 %v1943_v1 }
  0x4b   : > { %758 = vmatmul.mubr.bf16.gmra.mrb[8].mxu0 %v1849_v40  ;;  %1516 = vmatprep.mubr.msk.bf16.mxu1 %vm442_vm0, %v1851_v41 }
  0x4c   : > { %1008 = vmatpush1.bf16.msra.mxu0 %v1850_v42  ;;  %1549 = vmatprep.mubr.msk.bf16.mxu0 %vm442_vm0, %v1853_v43 }
  0x4d   : > { %1009 = vmatprep.subr.bf16.mxu0 %v1943_v1  ;;  %1717 = vmatpush1.bf16.msra.mxu1 %v1850_v42 }
  0x4e   : > { %1706 = vmatprep.subr.bf16.mxu1 %v1943_v1 }
  0x50   : > { %1010 = vmatpush1.bf16.msra.mxu0 %v1857_v44 }
  0x51   : > { %1011 = vmatprep.subr.bf16.mxu0 %v1943_v1  ;;  %1718 = vmatpush1.bf16.msra.mxu1 %v1857_v44  ;;  %v1172_v44 = vlaneseq }
  0x52   : > { %521 = vmatmul.mubr.bf16.gmra.mrb[12].mxu1 %v1855_v45  ;;  %1707 = vmatprep.subr.bf16.mxu1 %v1943_v1 }
  0x53   : > { %766 = vmatmul.mubr.bf16.gmra.mrb[12].mxu0 %v1856_v46  ;;  %1517 = vmatprep.mubr.msk.bf16.mxu1 %vm442_vm0, %v1859_v47 }
  0x54   : > { %1012 = vmatpush1.bf16.msra.mxu0 %v1858_v48  ;;  %1550 = vmatprep.mubr.msk.bf16.mxu0 %vm442_vm0, %v1861_v49 }
  0x55   : > { %1719 = vmatpush1.bf16.msra.mxu1 %v1858_v48  ;;  %1013 = vmatprep.subr.bf16.mxu0 %v1943_v1 }
  0x56   : > { %1708 = vmatprep.subr.bf16.mxu1 %v1943_v1 }
  0x58   : > { %1014 = vmatpush1.bf16.msra.mxu0 %v1865_v50 }
  0x59   : > { %1720 = vmatpush1.bf16.msra.mxu1 %v1865_v50  ;;  %1015 = vmatprep.subr.bf16.mxu0 %v1943_v1 }
  0x5a   : > { %529 = vmatmul.mubr.bf16.gmra.mrb[16].mxu1 %v1863_v51  ;;  %1709 = vmatprep.subr.bf16.mxu1 %v1943_v1 }
  0x5b   : > { %774 = vmatmul.mubr.bf16.gmra.mrb[16].mxu0 %v1864_v52  ;;  %1518 = vmatprep.mubr.msk.bf16.mxu1 %vm442_vm0, %v1866_v53  ;;  %v1173_v52 = vshrl.u32 %v1172_v44, 7 }
  0x5c   : > { %1551 = vmatprep.mubr.msk.bf16.mxu0 %vm442_vm0, %v1868_v54  ;;  %1016 = vmatpush1.bf16.msra.mxu0 %v1870_v55 }
  0x5d   : > { %1721 = vmatpush1.bf16.msra.mxu1 %v1870_v55  ;;  %1017 = vmatprep.subr.bf16.mxu0 %v1943_v1 }
  0x5e   : > { %1710 = vmatprep.subr.bf16.mxu1 %v1943_v1 }
  0x60   : > { %1018 = vmatpush1.bf16.msra.mxu0 %v1873_v56 }
  0x61   : > { %1722 = vmatpush1.bf16.msra.mxu1 %v1873_v56  ;;  %1019 = vmatprep.subr.bf16.mxu0 %v1943_v1  ;;  %v2262_v56 = vadd.s32 8, %v1173_v52 }
  0x62   : > { %537 = vmatmul.mubr.bf16.gmra.mrb[20].mxu1 %v1871_v57  ;;  %1711 = vmatprep.subr.bf16.mxu1 %v1943_v1 }
  0x63   : > { %782 = vmatmul.mubr.bf16.gmra.mrb[20].mxu0 %v1872_v58  ;;  %1519 = vmatprep.mubr.msk.bf16.mxu1 %vm442_vm0, %v1874_v59  ;;  %vm1184_vm2 = vcmp.lt.s32.totalorder %v2262_v56, 14 }
  0x64   : > { %1552 = vmatprep.mubr.msk.bf16.mxu0 %vm442_vm0, %v1876_v60  ;;  %1020 = vmatpush1.bf16.msra.mxu0 %v1880_v61 }
  0x65   : > { %1723 = vmatpush1.bf16.msra.mxu1 %v1880_v61  ;;  %1021 = vmatprep.subr.bf16.mxu0 %v1943_v1 }
  0x66   : > { %1712 = vmatprep.subr.bf16.mxu1 %v1943_v1  ;;  %v1890_v1 = vld [vmem:[%s2138_s5 + $0x54] ss:$8 sps:$4 sm:$0xff]   ;;  %s1761_s5 = smul.u32 28, %s2396_s13 }
  0x68   : > { %1022 = vmatpush1.bf16.msra.mxu0 %v1881_v62  ;;  %s205_s10 = sadd.s32 %s1761_s5, %s1455_s8 }
  0x69   : > { %1724 = vmatpush1.bf16.msra.mxu1 %v1881_v62  ;;  %s1456_s11 = sshll.u32 %s205_s10, 2 }
  0x6a   : > { %545 = vmatmul.mubr.bf16.gmra.mrb[24].mxu1 %v1878_v63  ;;  %s2286_s22 = scalar_lea.vmem %s2383_s2, %s1456_s11 }
  0x6b   : > { %790 = vmatmul.mubr.bf16.gmra.mrb[24].mxu0 %v1879_v0  ;;  %1609 = vmatprep.mubr.msk.bf16.mxu1 %vm442_vm0, %v1887_v2  ;;  %v2269_v0 = vstv %s198_s9 }
  0x6c   : > { %1605 = vmatprep.mubr.msk.bf16.mxu0 %vm442_vm0, %v1884_v3  ;;  %vm1185_vm1 = vcmp.lt.s32.totalorder %v2269_v0, 14 }
  0x6d   : > { %vm1193_vm3 = vmand %vm1184_vm2, %vm1185_vm1 }
  0x72   : > { %1064 = vmatmul.mubr.bf16.vlgmr.msra.gmra.mrb[28].mxu1 %v1885_v4  ;;  %v1944_v4 = vmov 0.0  }
  0x73   : > { %1032 = vmatmul.mubr.bf16.vlgmr.msra.gmra.mrb[0].mxu0 %v1882_v5  ;;  %1610 = vmatprep.mubr.msk.bf16.mxu1 %vm442_vm0, %v1890_v1  ;;  %v1626_v5 = vsel %vm1185_vm1, 1.0, %v1944_v4  ;;  %vm1302_vm1 = vcmask 1041408  }
  0x74   : > { %1606 = vmatprep.mubr.msk.bf16.mxu0 %vm442_vm0, %v1888_v6 }
  0x7a   : > { %1072 = vmatmul.mubr.bf16.gmra.mrb[32].mxu1 %v1893_v7  ;;  %v1177_v7 = vadd.s32 1, %v2269_v0 }
  0x7b   : > { %1040 = vmatmul.mubr.bf16.gmra.mrb[4].mxu0 %v1892_v8  ;;  %1611 = vmatprep.mubr.msk.bf16.mxu1 %vm442_vm0, %v1896_v9 }
  0x7c   : > { %1607 = vmatprep.mubr.msk.bf16.mxu0 %vm442_vm0, %v1894_v10  ;;  %vm1186_vm4 = vcmp.lt.s32.totalorder %v1177_v7, 14 }
  0x7d   : > { %vm1195_vm5 = vmand %vm1184_vm2, %vm1186_vm4 }
  0x82   : > { %1080 = vmatmul.mubr.bf16.gmra.mrb[36].mxu1 %v1899_v11 }
  0x83   : > { %1048 = vmatmul.mubr.bf16.gmra.mrb[8].mxu0 %v1898_v12  ;;  %v1627_v12 = vsel %vm1193_vm3, 1.0, %v1944_v4 }
  0x84   : > { %1608 = vmatprep.mubr.msk.bf16.mxu0 %vm442_vm0, %v1900_v13  ;;  %vm1300_vm0 = vcmask 1040384  }
  0x8b   : > { %1056 = vmatmul.mubr.bf16.gmra.mrb[12].mxu0 %v1902_v14 }
 0x10d   : > { %v2243_v15 = vpop.f32.mrb[0].mxu1 }
 0x10e   : > { %v500_v16 = vpop.f32.mrb[1].mxu1 }
 0x10f   : > { %v2245_v17 = vpop.f32.mrb[2].mxu1 }
 0x110   : > { %v503_v18 = vpop.f32.mrb[3].mxu1 }
 0x115   : > { %v2247_v19 = vpop.f32.mrb[4].mxu1 }
 0x116   : > { %v508_v20 = vpop.f32.mrb[5].mxu1 }
 0x117   : > { %v2249_v21 = vpop.f32.mrb[6].mxu1 }
 0x118   : > { %v511_v22 = vpop.f32.mrb[7].mxu1 }
 0x11d   : > { %v2251_v23 = vpop.f32.mrb[8].mxu1 }
 0x11e   : > { %v516_v24 = vpop.f32.mrb[9].mxu1 }
 0x11f   : > { %v2253_v25 = vpop.f32.mrb[10].mxu1 }
 0x120   : > { %v519_v26 = vpop.f32.mrb[11].mxu1 }
 0x125   : > { %v2255_v27 = vpop.f32.mrb[12].mxu1 }
 0x126   : > { %v524_v28 = vpop.f32.mrb[13].mxu1 }
 0x127   : > { %v2257_v29 = vpop.f32.mrb[14].mxu1 }
 0x128   : > { %v527_v30 = vpop.f32.mrb[15].mxu1 }
 0x12d   : > { %v530_v31 = vpop.f32.mrb[16].mxu1 }
 0x12e   : > { %v775_v32 = vpop.f32.mrb[16].mxu0  ;;  %v532_v33 = vpop.f32.mrb[17].mxu1 }
 0x12f   : > { %v776_v34 = vadd.f32 %v775_v32, %v530_v31  ;;  %v777_v35 = vpop.f32.mrb[17].mxu0  ;;  %v533_v36 = vpop.f32.mrb[18].mxu1  ;;  %v1628_v33 = vsel %vm1186_vm4, 1.0, %v1944_v4 }
 0x130   : > { %v778_v37 = vpop.f32.mrb[18].mxu0  ;;  %v535_v38 = vpop.f32.mrb[19].mxu1  ;;  %v1178_v35 = vadd.s32 2, %v2269_v0 }
 0x131   : > { %v779_v39 = vadd.f32 %v778_v37, %v533_v36  ;;  %v780_v40 = vpop.f32.mrb[19].mxu0 }
 0x132   : > { %vm1187_vm6 = vcmp.lt.s32.totalorder %v1178_v35, 14 }
 0x133   : > { %vm1197_vm7 = vmand %vm1184_vm2, %vm1187_vm6 }
 0x134   : > { %v1631_v7 = vsel %vm1197_vm7, 1.0, %v1944_v4 }
 0x135   : > { %v538_v41 = vpop.f32.mrb[20].mxu1 }
 0x136   : > { %v783_v42 = vpop.f32.mrb[20].mxu0  ;;  %v540_v43 = vpop.f32.mrb[21].mxu1 }
 0x137   : > { %v784_v45 = vadd.f32 %v783_v42, %v538_v41  ;;  %v785_v46 = vpop.f32.mrb[21].mxu0  ;;  %v541_v47 = vpop.f32.mrb[22].mxu1  ;;  %v1629_v41 = vsel %vm1195_vm5, 1.0, %v1944_v4 }
 0x138   : > { %v786_v48 = vpop.f32.mrb[22].mxu0  ;;  %v543_v49 = vpop.f32.mrb[23].mxu1 }
 0x139   : > { %v2260_v50 = vadd.f32 %v786_v48, %v541_v47  ;;  %v788_v51 = vpop.f32.mrb[23].mxu0 }
 0x13d   : > { %v546_v53 = vpop.f32.mrb[24].mxu1 }
 0x13e   : > { %v791_v54 = vpop.f32.mrb[24].mxu0  ;;  %v548_v55 = vpop.f32.mrb[25].mxu1 }
 0x13f   : > { %v2264_v57 = vadd.f32 %v791_v54, %v546_v53  ;;  %v793_v58 = vpop.f32.mrb[25].mxu0  ;;  %v549_v59 = vpop.f32.mrb[26].mxu1 }
 0x140   : > { %v794_v60 = vpop.f32.mrb[26].mxu0  ;;  %v551_v61 = vpop.f32.mrb[27].mxu1 }
 0x141   : > { %v2267_v62 = vadd.f32 %v794_v60, %v549_v59  ;;  %v796_v63 = vpop.f32.mrb[27].mxu0  ;;  %v1179_v60 = vadd.s32 3, %v2269_v0 }
 0x143   : > { %vm1188_vm8 = vcmp.lt.s32.totalorder %v1179_v60, 14 }
 0x144   : > { %vm1199_vm10 = vmand %vm1184_vm2, %vm1188_vm8 }
 0x145   : > { %v1065_v2 = vpop.f32.mrb[28].mxu1 }
 0x146   : > { %v1033_v3 = vpop.f32.mrb[0].mxu0  ;;  %v2276_v1 = vadd.f32 %v1065_v2, %v776_v34  ;;  %v1067_v6 = vpop.f32.mrb[29].mxu1 }
 0x147   : > { %v1725_v8 = vadd.f32 %v1033_v3, %v2243_v15  ;;  %v1035_v9 = vpop.f32.mrb[1].mxu0  ;;  %v1068_v10 = vpop.f32.mrb[30].mxu1 }
 0x148   : > { %v1036_v11 = vpop.f32.mrb[2].mxu0  ;;  %v2281_v13 = vadd.f32 %v1068_v10, %v779_v39  ;;  %v1070_v14 = vpop.f32.mrb[31].mxu1 }
 0x149   : > { %v1234_v16 = vmul.f32 %v1725_v8, %v1626_v5  ;;  %v1726_v18 = vadd.f32 %v1036_v11, %v2245_v17  ;;  %v1038_v20 = vpop.f32.mrb[3].mxu0  ;;  %v1180_v5 = vadd.s32 4, %v2269_v0 }
 0x14a   : > { %v1683_v15 = vpack.c.bf16 %v2281_v13, %v2276_v1  ;;  %v1181_v20 = vadd.s32 5, %v2269_v0 }
 0x14b   : > { %v1663_v22 = vpack.c.bf16 %v1726_v18, %v1725_v8  ;;  %v1235_v24 = vmul.f32 %v1726_v18, %v1627_v12  ;;  %v1267_v26 = vmul.f32 %v1725_v8, %v1234_v16  ;;  %vm1189_vm9 = vcmp.lt.s32.totalorder %v1180_v5, 14 }
 0x14c   : > { %1698 = vst [vmem:[%s2286_s22 + $0x20] sm:$0xff] %v1683_v15   ;;  %vm1201_vm11 = vmand %vm1184_vm2, %vm1189_vm9  ;;  %vm1190_vm12 = vcmp.lt.s32.totalorder %v1181_v20, 14 }
 0x14d   : > { %1664 = vst [vmem:[%s2286_s22] sm:$0xff] %v1663_v22   ;;  %v1248_v28 = vadd.f32 %v1235_v24, %v1234_v16  ;;  %v1268_v30 = vmul.f32 %v1726_v18, %v1235_v24  ;;  %v1073_v31 = vpop.f32.mrb[32].mxu1  ;;  %v1632_v24 = vsel %vm1188_vm8, 1.0, %v1944_v4  ;;  %vm1203_vm13 = vmand %vm1184_vm2, %vm1190_vm12 }
 0x14e   : > { %v1041_v32 = vpop.f32.mrb[4].mxu0  ;;  %v2296_v17 = vadd.f32 %v1073_v31, %v784_v45  ;;  %v1075_v34 = vpop.f32.mrb[33].mxu1 }
 0x14f   : > { %v1281_v36 = vadd.f32 %v1268_v30, %v1267_v26  ;;  %v1727_v37 = vadd.f32 %v1041_v32, %v2247_v19  ;;  %v1043_v38 = vpop.f32.mrb[5].mxu0  ;;  %v1076_v39 = vpop.f32.mrb[34].mxu1  ;;  %v1634_v26 = vsel %vm1189_vm9, 1.0, %v1944_v4  ;;  %v1182_v32 = vadd.s32 6, %v2269_v0 }
 0x150   : > { %v1044_v40 = vpop.f32.mrb[6].mxu0  ;;  %v2302_v42 = vadd.f32 %v1076_v39, %v2260_v50  ;;  %v1078_v43 = vpop.f32.mrb[35].mxu1  ;;  %v1633_v34 = vsel %vm1199_vm10, 1.0, %v1944_v4  ;;  %v1242_v38 = vmul.f32 %v1634_v26, %v2276_v1  ;;  %v1635_v39 = vsel %vm1201_vm11, 1.0, %v1944_v4 }
 0x151   : > { %v1236_v44 = vmul.f32 %v1727_v37, %v1628_v33  ;;  %v1728_v45 = vadd.f32 %v1044_v40, %v2249_v21  ;;  %v1046_v46 = vpop.f32.mrb[7].mxu0  ;;  %v1630_v21 = vsel %vm1187_vm6, 1.0, %v1944_v4  ;;  %v1636_v0 = vsel %vm1190_vm12, 1.0, %v1944_v4 }
 0x152   : > { %v1688_v47 = vpack.c.bf16 %v2302_v42, %v2296_v17  ;;  %vm1191_vm14 = vcmp.lt.s32.totalorder %v1182_v32, 14 }
 0x153   : > { %v1249_v19 = vadd.f32 %v1248_v28, %v1236_v44  ;;  %v1269_v48 = vmul.f32 %v1727_v37, %v1236_v44  ;;  %v1668_v49 = vpack.c.bf16 %v1728_v45, %v1727_v37  ;;  %v1237_v51 = vmul.f32 %v1728_v45, %v1629_v41  ;;  %vm1205_vm15 = vmand %vm1184_vm2, %vm1191_vm14 }
 0x154   : > { %1699 = vst [vmem:[%s2286_s22 + $0x28] sm:$0xff] %v1688_v47   ;;  %v1243_v44 = vmul.f32 %v1635_v39, %v2281_v13  ;;  %v1637_v47 = vsel %vm1203_vm13, 1.0, %v1944_v4 }
 0x155   : > { %v1282_v52 = vadd.f32 %v1281_v36, %v1269_v48  ;;  %1695 = vst [vmem:[%s2286_s22 + $0x8] sm:$0xff] %v1668_v49   ;;  %v1250_v53 = vadd.f32 %v1249_v19, %v1237_v51  ;;  %v1270_v54 = vmul.f32 %v1728_v45, %v1237_v51  ;;  %v1081_v50 = vpop.f32.mrb[36].mxu1  ;;  %v1275_v19 = vmul.f32 %v1242_v38, %v2276_v1 }
 0x156   : > { %v1049_v55 = vpop.f32.mrb[8].mxu0  ;;  %v2313_v58 = vadd.f32 %v1081_v50, %v2264_v57  ;;  %v1083_v59 = vpop.f32.mrb[37].mxu1  ;;  %v1244_v48 = vmul.f32 %v1636_v0, %v2296_v17 }
 0x157   : > { %v1283_v61 = vadd.f32 %v1282_v52, %v1270_v54  ;;  %v1729_v63 = vadd.f32 %v1049_v55, %v2251_v23  ;;  %v1051_v2 = vpop.f32.mrb[9].mxu0  ;;  %v1084_v3 = vpop.f32.mrb[38].mxu1  ;;  %v1638_v52 = vsel %vm1191_vm14, 1.0, %v1944_v4  ;;  %v1245_v54 = vmul.f32 %v1637_v47, %v2302_v42 }
 0x158   : > { %v1052_v6 = vpop.f32.mrb[10].mxu0  ;;  %v2320_v8 = vadd.f32 %v1084_v3, %v2267_v62  ;;  %v1086_v57 = vpop.f32.mrb[39].mxu1  ;;  %v1277_v1 = vmul.f32 %v1244_v48, %v2296_v17  ;;  %v1246_v59 = vmul.f32 %v1638_v52, %v2313_v58 }
 0x159   : > { %v1238_v9 = vmul.f32 %v1729_v63, %v1630_v21  ;;  %v1730_v10 = vadd.f32 %v1052_v6, %v2253_v25  ;;  %v1054_v11 = vpop.f32.mrb[11].mxu0  ;;  %v1639_v21 = vsel %vm1205_vm15, 1.0, %v1944_v4 }
 0x15a   : > { %v1693_v23 = vpack.c.bf16 %v2320_v8, %v2313_v58  ;;  %v1279_v3 = vmul.f32 %v1246_v59, %v2313_v58 }
 0x15b   : > { %v1251_v12 = vadd.f32 %v1250_v53, %v1238_v9  ;;  %v1271_v14 = vmul.f32 %v1729_v63, %v1238_v9  ;;  %v1673_v16 = vpack.c.bf16 %v1730_v10, %v1729_v63  ;;  %v1239_v18 = vmul.f32 %v1730_v10, %v1631_v7 }
 0x15c   : > { %1700 = vst [vmem:[%s2286_s22 + $0x30] sm:$0xff] %v1693_v23   ;;  %v1276_v53 = vmul.f32 %v1243_v44, %v2281_v13  ;;  %v1247_v63 = vmul.f32 %v1639_v21, %v2320_v8 }
 0x15d   : > { %v1284_v15 = vadd.f32 %v1283_v61, %v1271_v14  ;;  %1696 = vst [vmem:[%s2286_s22 + $0x10] sm:$0xff] %v1673_v16   ;;  %v1252_v62 = vadd.f32 %v1251_v12, %v1239_v18  ;;  %v1272_v22 = vmul.f32 %v1730_v10, %v1239_v18  ;;  %v1278_v61 = vmul.f32 %v1245_v54, %v2302_v42 }
 0x15e   : > { %v1057_v25 = vpop.f32.mrb[12].mxu0  ;;  %v1280_v4 = vmul.f32 %v1247_v63, %v2320_v8 }
 0x15f   : > { %v1285_v28 = vadd.f32 %v1284_v15, %v1272_v22  ;;  %v1731_v30 = vadd.f32 %v1057_v25, %v2255_v27  ;;  %v1059_v31 = vpop.f32.mrb[13].mxu0 }
 0x160   : > { %v1060_v33 = vpop.f32.mrb[14].mxu0 }
 0x161   : > { %v1240_v35 = vmul.f32 %v1731_v30, %v1632_v24  ;;  %v1732_v36 = vadd.f32 %v1060_v33, %v2257_v29  ;;  %v1062_v37 = vpop.f32.mrb[15].mxu0 }
 0x163   : > { %v1253_v27 = vadd.f32 %v1252_v62, %v1240_v35  ;;  %v1273_v40 = vmul.f32 %v1731_v30, %v1240_v35  ;;  %v1678_v41 = vpack.c.bf16 %v1732_v36, %v1731_v30  ;;  %v1241_v43 = vmul.f32 %v1732_v36, %v1633_v34 }
 0x165   : > { %v1286_v45 = vadd.f32 %v1285_v28, %v1273_v40  ;;  %1697 = vst [vmem:[%s2286_s22 + $0x18] sm:$0xff] %v1678_v41   ;;  %v1254_v29 = vadd.f32 %v1253_v27, %v1241_v43  ;;  %v1274_v46 = vmul.f32 %v1732_v36, %v1241_v43 }
 0x167   : > { %v1255_v49 = vadd.f32 %v1254_v29, %v1242_v38  ;;  %v1287_v51 = vadd.f32 %v1286_v45, %v1274_v46 }
 0x169   : > { %v1256_v50 = vadd.f32 %v1255_v49, %v1243_v44  ;;  %v1288_v55 = vadd.f32 %v1287_v51, %v1275_v19 }
 0x16b   : > { %v1257_v60 = vadd.f32 %v1256_v50, %v1244_v48  ;;  %v1289_v56 = vadd.f32 %v1288_v55, %v1276_v53 }
 0x16d   : > { %v1258_v13 = vadd.f32 %v1257_v60, %v1245_v54  ;;  %v1290_v2 = vadd.f32 %v1289_v56, %v1277_v1 }
 0x16f   : > { %v1259_v5 = vadd.f32 %v1258_v13, %v1246_v59  ;;  %v1291_v6 = vadd.f32 %v1290_v2, %v1278_v61 }
 0x171   : > { %v1260_v7 = vadd.f32 %v1259_v5, %v1247_v63  ;;  %v1292_v17 = vadd.f32 %v1291_v6, %v1279_v3 }
 0x173   : > { %v1261_v57 = vrot.slane %v1260_v7, 4  ;;  %v1293_v9 = vadd.f32 %v1292_v17, %v1280_v4 }
 0x175   : > { %v1262_v10 = vadd.f32 %v1261_v57, %v1260_v7  ;;  %v1294_v11 = vrot.slane %v1293_v9, 4 }
 0x177   : > { %v1263_v42 = vrot.slane %v1262_v10, 2  ;;  %v1295_v23 = vadd.f32 %v1294_v11, %v1293_v9 }
 0x179   : > { %v1264_v12 = vadd.f32 %v1263_v42, %v1262_v10  ;;  %v1296_v14 = vrot.slane %v1295_v23, 2 }
 0x17b   : > { %v1265_v16 = vrot.slane %v1264_v12, 1  ;;  %v1297_v58 = vadd.f32 %v1296_v14, %v1295_v23 }
 0x17d   : > { %v1298_v18 = vrot.slane %v1297_v58, 1  ;;  %v1266_v8 = vadd.f32 %v1265_v16, %v1264_v12 }
 0x17f   : > { %v1299_v20 = vadd.f32 %v1298_v18, %v1297_v58 }
 0x181   : > { %v1301_v15 = vsel %vm1300_vm0, %v1266_v8, %v1299_v20 }
 0x182   : > { %v1303_v62 = vsel %vm1302_vm1, %v1301_v15, 0.0 }
 0x183   : > { %1304 = vst [vmem:[%s216_s4] sm:$0xff] %v1303_v62 }
 0x184 PF: > { %s14_s16 = sadd.s32 1, %s1941_s16   ;;  %s2385_s12 = smov %s1933_s14 }
 0x185   : > { %p11_p8 = scmp.ge.s32.totalorder %s14_s16, 6   ;;  %s2386_s13 = smov %s1937_s15 }
 0x186   : > { %s2387_s14 = smov %s2390_s17  ;;  %s2388_s15 = smov %s2394_s18 }
 0x187   :  { %13 = sbr.rel (!%p11_p8) target bundleno = 3 (0x3), region = 75 }

// kernel: unet_bottleneck.7
= control target key start
LH: loop header
LB: loop body
LE: loop exit
PB: predicated region body
PF: predicated region fallthrough
CT: control target
= control target key end

     0   :  { %s514_s12 = smov 0   ;;  %s516_s13 = smov 0   ;;  %s600_s0 = inlined_call_operand.vmem [shape: bf16[2,12,16,128], index: 0, kind: input, shape index: {}]   ;;  %s601_s1 = inlined_call_operand.vmem [shape: f32[1,128], index: 1, kind: input, shape index: {}]   ;;  %s602_s2 = inlined_call_operand.vmem [shape: f32[1,128], index: 2, kind: input, shape index: {}]   ;;  %s603_s3 = inlined_call_operand.vmem [shape: f32[2,12,12,128], index: 3, kind: output, shape index: {}]  }
   0x1   :  { %s518_s14 = smov 0   ;;  %s520_s15 = smov 0  }
   0x2   :  { %s522_s16 = smov 0  }
   0x3 LB: > { %s22_s17 = sadd.s32 1, %s484_s14  ;;  %s25_s18 = sadd.s32 1, %s488_s15  ;;  %s492_s16 = sphi %s522_s16, %s13_s16   ;;  %s488_s15 = sphi %s520_s15, %s607_s15   ;;  %s484_s14 = sphi %s518_s14, %s606_s14   ;;  %s480_s13 = sphi %s516_s13, %s605_s13   ;;  %s476_s12 = sphi %s514_s12, %s604_s12  }
   0x4   : > { %p23_p0 = scmp.ge.s32.totalorder %s22_s17, 2  ;;  %p404_p1 = scmp.ge.s32.totalorder %s492_s16, 1 }
   0x5   : > { %p159_p2 = scmp.lt.s32.totalorder %s492_s16, 5 }
   0x6   : > { %s609_s17 = smov (%p23_p0, %s22_s17), 0  ;;  %s611_s18 = smov (!%p23_p0, %s25_s18), %s488_s15 }
   0x7   : > { %p160_p3 = pnand %p404_p1, %p159_p2  ;;  %p27_p4 = scmp.ge.s32.totalorder %s611_s18, 2 }
   0x8   : > { %s193_s19 = smul.u32 (!%p160_p3), 6, %s476_s12  ;;  %p194_p5 = scmp.lt.s32.totalorder (!%p160_p3), %s480_s13, 1  ;;  %v409_v0 = vld [vmem:[%s601_s1] ss:$0 sm:$0xff] (!%p160_p3) }
   0x9   : > { %s613_s18 = smov (%p27_p4, %s611_s18), 0  ;;  %163 = sbr.rel (%p160_p3) target bundleno = 41 (0x29), region = 32 }
   0xa   : > { %p196_p6 = scmp.lt.s32.totalorder (!%p160_p3), %s193_s19, 11  ;;  %v410_v11 = vld [vmem:[%s602_s2] ss:$0 sm:$0xff] (!%p160_p3) }
  0x10   : > { %s615_s13 = smov (!%p194_p5, %s480_s13), 1  ;;  %s617_s19 = smov (!%p196_p6, %s193_s19), 11 }
  0x11   : > { %s413_s20 = smul.u32 24, %s615_s13  ;;  %s405_s21 = sshll.u32 %s617_s19, 1 }
  0x13   : > { %s544_s22 = sadd.s32 %s413_s20, %s405_s21 }
  0x14   : > { %s406_s23 = sshll.u32 %s544_s22, 2  ;;  %s408_s4 = sshll.u32 %s544_s22, 3 }
  0x15   : > { %s550_s26 = scalar_lea.vmem %s600_s0, %s406_s23  ;;  %s568_s7 = scalar_lea.vmem %s603_s3, %s408_s4 }
  0x16   : > { %v215_v1 = vld [vmem:[%s550_s26] ss:$8 sps:$4 sm:$0xff]   ;;  %v216_v2 = vld [vmem:[%s550_s26 + $0x4] sm:$0x3]  ;;  %v218_v3 = vld [vmem:[%s550_s26 + $0xc] sm:$0x3] }
  0x17   : > { %v227_v4 = vunpack.c.l.bf16 %v215_v1  ;;  %v228_v5 = vunpack.c.l.bf16 %v216_v2  ;;  %v229_v6 = vunpack.c.h.bf16 %v215_v1  ;;  %v230_v7 = vunpack.c.l.bf16 %v218_v3  ;;  %v219_v8 = vld [vmem:[%s550_s26 + $0x10] ss:$8 sps:$4 sm:$0xff]   ;;  %v220_v9 = vld [vmem:[%s550_s26 + $0x14] sm:$0x3]  ;;  %v222_v10 = vld [vmem:[%s550_s26 + $0x1c] sm:$0x3] }
  0x18   : > { %v231_v12 = vunpack.c.l.bf16 %v219_v8  ;;  %v232_v13 = vunpack.c.l.bf16 %v220_v9  ;;  %v233_v14 = vunpack.c.h.bf16 %v219_v8  ;;  %v234_v15 = vunpack.c.l.bf16 %v222_v10  ;;  %v223_v32 = vld [vmem:[%s550_s26 + $0x20] ss:$8 sps:$4 sm:$0xff]   ;;  %v224_v33 = vld [vmem:[%s550_s26 + $0x24] sm:$0x3]  ;;  %v226_v34 = vld [vmem:[%s550_s26 + $0x2c] sm:$0x3] }
  0x19   : > { %v246_v16 = vmul.f32 %v409_v0, %v227_v4  ;;  %v247_v17 = vmul.f32 %v409_v0, %v228_v5  ;;  %v248_v18 = vmul.f32 %v409_v0, %v229_v6  ;;  %v249_v19 = vmul.f32 %v409_v0, %v230_v7 }
  0x1a   : > { %v250_v20 = vmul.f32 %v409_v0, %v231_v12  ;;  %v251_v21 = vmul.f32 %v409_v0, %v232_v13  ;;  %v252_v22 = vmul.f32 %v409_v0, %v233_v14  ;;  %v253_v23 = vmul.f32 %v409_v0, %v234_v15 }
  0x1b   : > { %v265_v24 = vadd.f32 %v410_v11, %v246_v16  ;;  %v266_v25 = vadd.f32 %v410_v11, %v247_v17  ;;  %v267_v26 = vadd.f32 %v410_v11, %v248_v18  ;;  %v268_v27 = vadd.f32 %v410_v11, %v249_v19 }
  0x1c   : > { %v269_v28 = vadd.f32 %v410_v11, %v250_v20  ;;  %v270_v29 = vadd.f32 %v410_v11, %v251_v21  ;;  %v271_v30 = vadd.f32 %v410_v11, %v252_v22  ;;  %v272_v31 = vadd.f32 %v410_v11, %v253_v23 }
  0x1d   : > { %v277_v35 = vmax.f32 %v265_v24, 0.0  ;;  %v278_v36 = vmax.f32 %v266_v25, 0.0  ;;  %v279_v37 = vmax.f32 %v267_v26, 0.0  ;;  %v280_v38 = vmax.f32 %v268_v27, 0.0 }
  0x1e   : > { %v281_v39 = vmax.f32 %v269_v28, 0.0  ;;  %v282_v40 = vmax.f32 %v270_v29, 0.0  ;;  %v283_v41 = vmax.f32 %v271_v30, 0.0  ;;  %v284_v42 = vmax.f32 %v272_v31, 0.0 }
  0x1f   : > { %289 = vst [vmem:[%s568_s7] sm:$0xff] %v277_v35  ;;  %290 = vst [vmem:[%s568_s7 + $0x8] sm:$0xf] %v278_v36  ;;  %v235_v43 = vunpack.c.l.bf16 %v223_v32  ;;  %v236_v44 = vunpack.c.l.bf16 %v224_v33  ;;  %v237_v45 = vunpack.c.h.bf16 %v223_v32  ;;  %v238_v46 = vunpack.c.l.bf16 %v226_v34 }
  0x20   : > { %291 = vst [vmem:[%s568_s7 + $0x10] sm:$0xff] %v279_v37  ;;  %292 = vst [vmem:[%s568_s7 + $0x18] sm:$0xf] %v280_v38 }
  0x21   : > { %293 = vst [vmem:[%s568_s7 + $0x20] sm:$0xff] %v281_v39  ;;  %294 = vst [vmem:[%s568_s7 + $0x28] sm:$0xf] %v282_v40  ;;  %v254_v47 = vmul.f32 %v409_v0, %v235_v43  ;;  %v255_v48 = vmul.f32 %v409_v0, %v236_v44  ;;  %v256_v49 = vmul.f32 %v409_v0, %v237_v45 }
  0x22   : > { %295 = vst [vmem:[%s568_s7 + $0x30] sm:$0xff] %v283_v41  ;;  %296 = vst [vmem:[%s568_s7 + $0x38] sm:$0xf] %v284_v42  ;;  %v257_v50 = vmul.f32 %v409_v0, %v238_v46 }
  0x23   : > { %v273_v51 = vadd.f32 %v410_v11, %v254_v47  ;;  %v274_v52 = vadd.f32 %v410_v11, %v255_v48  ;;  %v275_v53 = vadd.f32 %v410_v11, %v256_v49 }
  0x24   : > { %v276_v54 = vadd.f32 %v410_v11, %v257_v50 }
  0x25   : > { %v285_v55 = vmax.f32 %v273_v51, 0.0  ;;  %v286_v56 = vmax.f32 %v274_v52, 0.0  ;;  %v287_v57 = vmax.f32 %v275_v53, 0.0 }
  0x26   : > { %v288_v58 = vmax.f32 %v276_v54, 0.0 }
  0x27   : > { %297 = vst [vmem:[%s568_s7 + $0x40] sm:$0xff] %v285_v55  ;;  %298 = vst [vmem:[%s568_s7 + $0x48] sm:$0xf] %v286_v56 }
  0x28   : > { %299 = vst [vmem:[%s568_s7 + $0x50] sm:$0xff] %v287_v57  ;;  %300 = vst [vmem:[%s568_s7 + $0x58] sm:$0xf] %v288_v58 }
  0x29 PF: > { %s13_s16 = sadd.s32 1, %s492_s16   ;;  %s604_s12 = smov %s484_s14 }
  0x2a   : > { %p10_p7 = scmp.ge.s32.totalorder %s13_s16, 6   ;;  %s605_s13 = smov %s488_s15 }
  0x2b   : > { %s606_s14 = smov %s609_s17  ;;  %s607_s15 = smov %s613_s18 }
  0x2c   :  { %12 = sbr.rel (!%p10_p7) target bundleno = 3 (0x3), region = 62 }

// kernel: unet_bottleneck.6
= control target key start
LH: loop header
LB: loop body
LE: loop exit
PB: predicated region body
PF: predicated region fallthrough
CT: control target
= control target key end

     0   :  { %s2893_s12 = smov 0   ;;  %s2895_s13 = smov 0   ;;  %s3371_s0 = inlined_call_operand.vmem [shape: bf16[2,224,384], index: 0, kind: input, shape index: {}]   ;;  %s3372_s1 = inlined_call_operand.vmem [shape: bf16[3,384,128], index: 1, kind: input, shape index: {}]   ;;  %s3373_s2 = inlined_call_operand.vmem [shape: bf16[2,12,16,128], index: 2, kind: output, shape index: {0}]   ;;  %s3374_s3 = inlined_call_operand.vmem [shape: f32[2,2,8,128], index: 3, kind: output, shape index: {1}]  }
   0x1   :  { %s2897_s14 = smov 0   ;;  %s2899_s15 = smov 0  }
   0x2   :  { %s2901_s16 = smov 0  }
   0x3 LB: > { %s23_s17 = sadd.s32 1, %s2862_s14  ;;  %s26_s18 = sadd.s32 1, %s2866_s15  ;;  %s2870_s16 = sphi %s2901_s16, %s14_s16   ;;  %s2866_s15 = sphi %s2899_s15, %s3380_s15   ;;  %s2862_s14 = sphi %s2897_s14, %s3379_s14   ;;  %s2858_s13 = sphi %s2895_s13, %s3378_s13   ;;  %s2854_s12 = sphi %s2893_s12, %s3377_s12  }
   0x4   : > { %p24_p0 = scmp.ge.s32.totalorder %s23_s17, 2  ;;  %p1996_p1 = scmp.ge.s32.totalorder %s2870_s16, 1 }
   0x5   : > { %p156_p2 = scmp.lt.s32.totalorder %s2870_s16, 5 }
   0x6   : > { %s3382_s17 = smov (%p24_p0, %s23_s17), 0  ;;  %s3384_s18 = smov (!%p24_p0, %s26_s18), %s2866_s15 }
   0x7   : > { %p157_p3 = pnand %p1996_p1, %p156_p2  ;;  %p28_p4 = scmp.ge.s32.totalorder %s3384_s18, 2 }
   0x8   : > { %v2688_v0 = vld [vmem:[%s3372_s1 + $0x100] sm:$0xff] (!%p157_p3)   ;;  %v2691_v3 = vld [vmem:[%s3372_s1 + $0x108] sm:$0xff] (!%p157_p3)   ;;  %v2694_v6 = vld [vmem:[%s3372_s1 + $0x110] sm:$0xff] (!%p157_p3)   ;;  %p193_p5 = scmp.lt.s32.totalorder (!%p157_p3), %s2858_s13, 1  ;;  %s2956_s10 = smul.u32 (!%p157_p3), 96, %s2854_s12  ;;  %vm1844_vm13 = vcmask (!%p157_p3), 1040384  }
   0x9   : > { %s3386_s18 = smov (%p28_p4, %s3384_s18), 0  ;;  %160 = sbr.rel (%p157_p3) target bundleno = 398 (0x18e), region = 28 }
   0xa   : > { %v2689_v1 = vld [vmem:[%s3372_s1 + $0x140] sm:$0xff] (!%p157_p3)   ;;  %2303 = vmatprep.subr.bf16.mxu0 (!%p157_p3), %v2688_v0  ;;  %v2692_v4 = vld [vmem:[%s3372_s1 + $0x148] sm:$0xff] (!%p157_p3)   ;;  %v2695_v7 = vld [vmem:[%s3372_s1 + $0x150] sm:$0xff] (!%p157_p3)   ;;  %s296_s26 = sadd.s32 (!%p157_p3), 16, %s2956_s10  ;;  %s219_s25 = sshra.s32 (!%p157_p3), %s2956_s10, 3  ;;  %vm1846_vm14 = vcmask (!%p157_p3), 1041408  }
   0xb   : > { %v2690_v2 = vld [vmem:[%s3372_s1 + $0xc0] sm:$0xff] (!%p157_p3)   ;;  %2501 = vmatprep.subr.bf16.mxu1 (!%p157_p3), %v2689_v1  ;;  %v2693_v5 = vld [vmem:[%s3372_s1 + $0xc8] sm:$0xff] (!%p157_p3)   ;;  %v2696_v8 = vld [vmem:[%s3372_s1 + $0xd0] sm:$0xff] (!%p157_p3)   ;;  %s297_s5 = sshra.s32 (!%p157_p3), %s296_s26, 3  ;;  %p211_p7 = scmp.lt.s32.totalorder (!%p157_p3), %s2854_s12, 1 }
   0xc   : > { %2304 = vmatpush3.bf16.msra.mxu0 (!%p157_p3), %v2690_v2  ;;  %2502 = vmatpush3.bf16.msra.mxu1 (!%p157_p3), %v2689_v1  ;;  %v2697_v9 = vld [vmem:[%s3372_s1 + $0x118] sm:$0xff] (!%p157_p3)   ;;  %v2700_v12 = vld [vmem:[%s3372_s1 + $0x120] sm:$0xff] (!%p157_p3)   ;;  %v2703_v15 = vld [vmem:[%s3372_s1 + $0x128] sm:$0xff] (!%p157_p3)   ;;  %s2254_s11 = smul.u32 (!%p157_p3), 12, %s297_s5 }
   0xd   : > { %2305 = vmatprep.subr.bf16.mxu0 (!%p157_p3), %v2691_v3  ;;  %2503 = vmatprep.subr.bf16.mxu1 (!%p157_p3), %v2692_v4  ;;  %v2698_v10 = vld [vmem:[%s3372_s1 + $0x158] sm:$0xff] (!%p157_p3)   ;;  %v2701_v13 = vld [vmem:[%s3372_s1 + $0x160] sm:$0xff] (!%p157_p3)   ;;  %v2704_v16 = vld [vmem:[%s3372_s1 + $0x168] sm:$0xff] (!%p157_p3)  }
   0xe   : > { %v2699_v11 = vld [vmem:[%s3372_s1 + $0xd8] sm:$0xff] (!%p157_p3)   ;;  %v2702_v14 = vld [vmem:[%s3372_s1 + $0xe0] sm:$0xff] (!%p157_p3)   ;;  %v2705_v17 = vld [vmem:[%s3372_s1 + $0xe8] sm:$0xff] (!%p157_p3)  }
   0xf   : > { %v2706_v18 = vld [vmem:[%s3372_s1 + $0x130] sm:$0xff] (!%p157_p3)   ;;  %v2709_v21 = vld [vmem:[%s3372_s1 + $0x138] sm:$0xff] (!%p157_p3)   ;;  %v2716_v26 = vld [vmem:[%s3372_s1 + $0x40] sm:$0xff] (!%p157_p3)  }
  0x10   : > { %2306 = vmatpush3.bf16.msra.mxu0 %v2693_v5  ;;  %2504 = vmatpush3.bf16.msra.mxu1 %v2692_v4  ;;  %s3388_s13 = smov (!%p193_p5, %s2858_s13), 1  ;;  %v2707_v19 = vld [vmem:[%s3372_s1 + $0x170] sm:$0xff]   ;;  %v2710_v22 = vld [vmem:[%s3372_s1 + $0x178] sm:$0xff]   ;;  %v2717_v28 = vld [vmem:[%s3372_s1 + $0x1c0] sm:$0xff]  }
  0x11   : > { %2307 = vmatprep.subr.bf16.mxu0 %v2694_v6  ;;  %2505 = vmatprep.subr.bf16.mxu1 %v2695_v7  ;;  %s2645_s29 = smul.u32 336, %s3388_s13  ;;  %v2708_v20 = vld [vmem:[%s3372_s1 + $0xf0] sm:$0xff]   ;;  %v2711_v25 = vld [vmem:[%s3372_s1 + $0xf8] sm:$0xff]   ;;  %v2719_v30 = vld [vmem:[%s3372_s1] sm:$0xff]  }
  0x12   : > { %v2720_v31 = vld [vmem:[%s3372_s1 + $0x180] sm:$0xff]   ;;  %v2721_v32 = vld [vmem:[%s3372_s1 + $0x48] sm:$0xff]   ;;  %v2728_v37 = vld [vmem:[%s3372_s1 + $0x50] sm:$0xff]  }
  0x13   : > { %s2993_s23 = scalar_lea.vmem %s3371_s0, %s2645_s29  ;;  %v2723_v33 = vld [vmem:[%s3372_s1 + $0x1c8] sm:$0xff]   ;;  %v2729_v39 = vld [vmem:[%s3372_s1 + $0x10] sm:$0xff]   ;;  %v2730_v41 = vld [vmem:[%s3372_s1 + $0x58] sm:$0xff]   ;;  %s2253_s29 = smul.u32 12, %s219_s25 }
  0x14   : > { %2308 = vmatpush3.bf16.msra.mxu0 %v2696_v8  ;;  %2506 = vmatpush3.bf16.msra.mxu1 %v2695_v7  ;;  %s3005_s4 = scalar_lea.vmem %s2993_s23, %s2254_s11  ;;  %v2722_v35 = vld [vmem:[%s3372_s1 + $0x8] sm:$0xff]   ;;  %v2731_v40 = vld [vmem:[%s3372_s1 + $0x1d0] sm:$0xff]   ;;  %v2732_v44 = vld [vmem:[%s3372_s1 + $0x18] sm:$0xff]   ;;  %s1179_s25 = sadd.s32 32, %s2956_s10 }
  0x15   : > { %2309 = vmatprep.subr.bf16.mxu0 %v2697_v9  ;;  %2507 = vmatprep.subr.bf16.mxu1 %v2698_v10  ;;  %v2714_v23 = vld [vmem:[%s3005_s4 + $0x4] ss:$12 sps:$4 sm:$0xff]   ;;  %v2715_v24 = vld [vmem:[%s3005_s4 + $0x8] ss:$12 sps:$4 sm:$0xff]   ;;  %v2712_v27 = vld [vmem:[%s3005_s4] ss:$12 sps:$4 sm:$0xff]   ;;  %s3110_s21 = scalar_lea.vmem %s2993_s23, %s2253_s29 }
  0x16   : > { %647 = vmatprep.mubr.bf16.mxu0 %v2714_v23  ;;  %2517 = vmatprep.mubr.bf16.mxu1 %v2715_v24  ;;  %v2718_v29 = vld [vmem:[%s3005_s4 + $0x20] ss:$12 sps:$4 sm:$0xff]   ;;  %v2724_v34 = vld [vmem:[%s3005_s4 + $0x1c] ss:$12 sps:$4 sm:$0xff]   ;;  %v2727_v38 = vld [vmem:[%s3005_s4 + $0x18] ss:$12 sps:$4 sm:$0xff]  }
  0x17   : > { %v2726_v36 = vld [vmem:[%s3372_s1 + $0x188] sm:$0xff]   ;;  %v2733_v42 = vld [vmem:[%s3372_s1 + $0x190] sm:$0xff]   ;;  %v2736_v45 = vld [vmem:[%s3005_s4 + $0x38] ss:$12 sps:$4 sm:$0xff]   ;;  %s1180_s28 = sshra.s32 %s1179_s25, 3 }
  0x18   : > { %2310 = vmatpush3.bf16.msra.mxu0 %v2699_v11  ;;  %2508 = vmatpush3.bf16.msra.mxu1 %v2698_v10  ;;  %v2734_v43 = vld [vmem:[%s3005_s4 + $0x34] ss:$12 sps:$4 sm:$0xff]   ;;  %v2737_v46 = vld [vmem:[%s3005_s4 + $0x30] ss:$12 sps:$4 sm:$0xff]   ;;  %v2743_v52 = vld [vmem:[%s3372_s1 + $0x68] sm:$0xff]   ;;  %s2255_s6 = smul.u32 12, %s1180_s28 }
  0x19   : > { %2311 = vmatprep.subr.bf16.mxu0 %v2700_v12  ;;  %2509 = vmatprep.subr.bf16.mxu1 %v2701_v13  ;;  %v2738_v47 = vld [vmem:[%s3005_s4 + $0x50] ss:$12 sps:$4 sm:$0xff]   ;;  %v2739_v48 = vld [vmem:[%s3372_s1 + $0x60] sm:$0xff]   ;;  %v2744_v53 = vld [vmem:[%s3372_s1 + $0x28] sm:$0xff]  }
  0x1a   : > { %v2740_v49 = vld [vmem:[%s3372_s1 + $0x20] sm:$0xff]   ;;  %v2741_v50 = vld [vmem:[%s3372_s1 + $0x1d8] sm:$0xff]   ;;  %v2747_v55 = vld [vmem:[%s3005_s4 + $0x68] ss:$12 sps:$4 sm:$0xff]   ;;  %s3140_s19 = scalar_lea.vmem %s2993_s23, %s2255_s6 }
  0x1b   : > { %v2742_v51 = vld [vmem:[%s3372_s1 + $0x198] sm:$0xff]   ;;  %v2748_v56 = vld [vmem:[%s3005_s4 + $0x48] ss:$12 sps:$4 sm:$0xff]   ;;  %v2749_v57 = vld [vmem:[%s3005_s4 + $0x80] ss:$12 sps:$4 sm:$0xff]  }
  0x1c   : > { %2312 = vmatpush3.bf16.msra.mxu0 %v2702_v14  ;;  %2510 = vmatpush3.bf16.msra.mxu1 %v2701_v13  ;;  %v2745_v54 = vld [vmem:[%s3005_s4 + $0x4c] ss:$12 sps:$4 sm:$0xff]   ;;  %v2750_v58 = vld [vmem:[%s3372_s1 + $0x70] sm:$0xff]   ;;  %v2751_v59 = vld [vmem:[%s3372_s1 + $0x1e0] sm:$0xff]  }
  0x1d   : > { %2313 = vmatprep.subr.bf16.mxu0 %v2703_v15  ;;  %2511 = vmatprep.subr.bf16.mxu1 %v2704_v16  ;;  %v2752_v60 = vld [vmem:[%s3372_s1 + $0x30] sm:$0xff]   ;;  %v2753_v61 = vld [vmem:[%s3372_s1 + $0x1a0] sm:$0xff]   ;;  %v2754_v62 = vld [vmem:[%s3372_s1 + $0x78] sm:$0xff]  }
  0x1e   : > { %v2755_v63 = vld [vmem:[%s3372_s1 + $0x38] sm:$0xff]   ;;  %v2756_v0 = vld [vmem:[%s3372_s1 + $0x1e8] sm:$0xff]   ;;  %v2757_v1 = vld [vmem:[%s3005_s4 + $0x64] ss:$12 sps:$4 sm:$0xff]  }
  0x1f   : > { %v2759_v2 = vld [vmem:[%s3110_s21] ss:$12 sps:$4 sm:$0xff]   ;;  %v2761_v3 = vld [vmem:[%s3110_s21 + $0x4] ss:$12 sps:$4 sm:$0xff]   ;;  %v2766_v8 = vld [vmem:[%s3005_s4 + $0x7c] ss:$12 sps:$4 sm:$0xff]  }
  0x20   : > { %2314 = vmatpush3.bf16.msra.mxu0 %v2705_v17  ;;  %2512 = vmatpush3.bf16.msra.mxu1 %v2704_v16  ;;  %v2762_v4 = vld [vmem:[%s3372_s1 + $0x1a8] sm:$0xff]   ;;  %v2764_v6 = vld [vmem:[%s3372_s1 + $0x1f0] sm:$0xff]   ;;  %v2770_v10 = vld [vmem:[%s3005_s4 + $0x78] ss:$12 sps:$4 sm:$0xff]  }
  0x21   : > { %2315 = vmatprep.subr.bf16.mxu0 %v2706_v18  ;;  %2513 = vmatprep.subr.bf16.mxu1 %v2707_v19  ;;  %v2763_v5 = vld [vmem:[%s3005_s4 + $0x60] ss:$12 sps:$4 sm:$0xff]   ;;  %v2765_v7 = vld [vmem:[%s3372_s1 + $0x1b0] sm:$0xff]   ;;  %v2768_v9 = vld [vmem:[%s3110_s21 + $0x1c] ss:$12 sps:$4 sm:$0xff]   ;;  %s2000_s4 = sshll.u32 %s3388_s13, 1 }
  0x22   : > { %v2771_v11 = vld [vmem:[%s3110_s21 + $0x18] ss:$12 sps:$4 sm:$0xff]   ;;  %v2775_v15 = vld [vmem:[%s3110_s21 + $0x34] ss:$12 sps:$4 sm:$0xff]   ;;  %v2783_v23 = vld [vmem:[%s3372_s1 + $0x208] sm:$0xff]  }
  0x23   : > { %v2772_v12 = vld [vmem:[%s3372_s1 + $0x1f8] sm:$0xff]   ;;  %v2774_v14 = vld [vmem:[%s3372_s1 + $0x80] sm:$0xff]   ;;  %v2789_v24 = vld [vmem:[%s3372_s1 + $0x90] sm:$0xff]  }
  0x24   : > { %2316 = vmatpush3.bf16.msra.mxu0 %v2708_v20  ;;  %2514 = vmatpush3.bf16.msra.mxu1 %v2707_v19  ;;  %v2773_v13 = vld [vmem:[%s3372_s1 + $0x1b8] sm:$0xff]   ;;  %v2779_v16 = vld [vmem:[%s3140_s19 + $0x4] ss:$12 sps:$4 sm:$0xff]   ;;  %v2777_v18 = vld [vmem:[%s3140_s19] ss:$12 sps:$4 sm:$0xff]  }
  0x25   : > { %2317 = vmatprep.subr.bf16.mxu0 %v2709_v21  ;;  %2515 = vmatprep.subr.bf16.mxu1 %v2710_v22  ;;  %v2781_v17 = vld [vmem:[%s3372_s1 + $0x200] sm:$0xff]   ;;  %v2782_v19 = vld [vmem:[%s3372_s1 + $0x88] sm:$0xff]   ;;  %v2780_v20 = vld [vmem:[%s3110_s21 + $0x30] ss:$12 sps:$4 sm:$0xff]  }
  0x26   : > { %v2784_v21 = vld [vmem:[%s3110_s21 + $0x4c] ss:$12 sps:$4 sm:$0xff]  }
  0x28   : > { %2318 = vmatpush3.bf16.msra.mxu0 %v2711_v25  ;;  %2516 = vmatpush3.bf16.msra.mxu1 %v2710_v22  ;;  %v2786_v22 = vld [vmem:[%s3140_s19 + $0x1c] ss:$12 sps:$4 sm:$0xff]  }
  0x29   : > { %2369 = vmatprep.subr.bf16.mxu1 %v2716_v26  ;;  %2435 = vmatprep.subr.bf16.mxu0 %v2717_v28  ;;  %v2791_v25 = vld [vmem:[%s3372_s1 + $0x98] sm:$0xff]   ;;  %v2792_v26 = vld [vmem:[%s3372_s1 + $0x210] sm:$0xff]  }
  0x2a   : > { %v2790_v28 = vld [vmem:[%s3140_s19 + $0x18] ss:$12 sps:$4 sm:$0xff]  }
  0x2b   : > { %648 = vmatmul.mubr.bf16.vlgmr.msra.gmra.mrb[0].mxu0 %v2712_v27  ;;  %2518 = vmatmul.mubr.bf16.vlgmr.msra.gmra.mrb[0].mxu1 %v2718_v29  ;;  %v2788_v27 = vld [vmem:[%s3110_s21 + $0x48] ss:$12 sps:$4 sm:$0xff]   ;;  %v2793_v29 = vld [vmem:[%s3110_s21 + $0x64] ss:$12 sps:$4 sm:$0xff]  }
  0x2c   : > { %2370 = vmatpush3.bf16.msra.mxu1 %v2719_v30  ;;  %2436 = vmatpush3.bf16.msra.mxu0 %v2720_v31  ;;  %v2795_v30 = vld [vmem:[%s3140_s19 + $0x34] ss:$12 sps:$4 sm:$0xff]  }
  0x2d   : > { %2371 = vmatprep.subr.bf16.mxu1 %v2721_v32  ;;  %2437 = vmatprep.subr.bf16.mxu0 %v2723_v33  ;;  %v2798_v31 = vld [vmem:[%s3372_s1 + $0xa0] sm:$0xff]   ;;  %v2800_v32 = vld [vmem:[%s3372_s1 + $0x218] sm:$0xff]  }
  0x2e   : > { %655 = vmatprep.mubr.bf16.mxu0 %v2724_v34  ;;  %2521 = vmatprep.mubr.bf16.mxu1 %v2736_v45  ;;  %v2797_v33 = vld [vmem:[%s3110_s21 + $0x60] ss:$12 sps:$4 sm:$0xff]   ;;  %v2812_v45 = vld [vmem:[%s3110_s21 + $0x8] ss:$12 sps:$4 sm:$0xff]  }
  0x2f   : > { %v2801_v34 = vld [vmem:[%s3372_s1 + $0xa8] sm:$0xff]  }
  0x30   : > { %2372 = vmatpush3.bf16.msra.mxu1 %v2722_v35  ;;  %2438 = vmatpush3.bf16.msra.mxu0 %v2726_v36  ;;  %v2799_v35 = vld [vmem:[%s3140_s19 + $0x30] ss:$12 sps:$4 sm:$0xff]   ;;  %v2809_v36 = vld [vmem:[%s3372_s1 + $0x220] sm:$0xff]  }
  0x31   : > { %2373 = vmatprep.subr.bf16.mxu1 %v2728_v37  ;;  %2439 = vmatprep.subr.bf16.mxu0 %v2731_v40  ;;  %v2802_v37 = vld [vmem:[%s3110_s21 + $0x7c] ss:$12 sps:$4 sm:$0xff]  }
  0x32   : > { %v2811_v40 = vld [vmem:[%s3372_s1 + $0x228] sm:$0xff]  }
  0x33   : > { %656 = vmatmul.mubr.bf16.gmra.mrb[4].mxu0 %v2727_v38  ;;  %2522 = vmatmul.mubr.bf16.gmra.mrb[4].mxu1 %v2738_v47  ;;  %v2804_v38 = vld [vmem:[%s3140_s19 + $0x4c] ss:$12 sps:$4 sm:$0xff]  }
  0x34   : > { %2374 = vmatpush3.bf16.msra.mxu1 %v2729_v39  ;;  %2440 = vmatpush3.bf16.msra.mxu0 %v2733_v42  ;;  %v2807_v39 = vld [vmem:[%s3372_s1 + $0xb0] sm:$0xff]   ;;  %v2806_v42 = vld [vmem:[%s3110_s21 + $0x78] ss:$12 sps:$4 sm:$0xff]  }
  0x35   : > { %2375 = vmatprep.subr.bf16.mxu1 %v2730_v41  ;;  %663 = vmatprep.mubr.bf16.mxu0 %v2734_v43  ;;  %v2810_v41 = vld [vmem:[%s3372_s1 + $0xb8] sm:$0xff]   ;;  %v2817_v43 = vld [vmem:[%s3372_s1 + $0x230] sm:$0xff]  }
  0x36   : > { %2441 = vmatprep.subr.bf16.mxu0 %v2741_v50  ;;  %2525 = vmatprep.mubr.bf16.mxu1 %v2747_v55  ;;  %v2823_v47 = vld [vmem:[%s3372_s1 + $0x238] sm:$0xff]   ;;  %v2825_v55 = vld [vmem:[%s3140_s19 + $0x8] ss:$12 sps:$4 sm:$0xff]  }
  0x37   : > { %v2818_v50 = vld [vmem:[%s3110_s21 + $0x38] ss:$12 sps:$4 sm:$0xff]  }
  0x38   : > { %2376 = vmatpush3.bf16.msra.mxu1 %v2732_v44  ;;  %2442 = vmatpush3.bf16.msra.mxu0 %v2742_v51  ;;  %v2808_v44 = vld [vmem:[%s3140_s19 + $0x48] ss:$12 sps:$4 sm:$0xff]  }
  0x39   : > { %2377 = vmatprep.subr.bf16.mxu1 %v2739_v48  ;;  %2443 = vmatprep.subr.bf16.mxu0 %v2751_v59  ;;  %v2815_v48 = vld [vmem:[%s3110_s21 + $0x20] ss:$12 sps:$4 sm:$0xff]   ;;  %v2819_v51 = vld [vmem:[%s3140_s19 + $0x7c] ss:$12 sps:$4 sm:$0xff]  }
  0x3a   : > { %v2829_v59 = vld [vmem:[%s3140_s19 + $0x50] ss:$12 sps:$4 sm:$0xff]  }
  0x3b   : > { %664 = vmatmul.mubr.bf16.gmra.mrb[8].mxu0 %v2737_v46  ;;  %2526 = vmatmul.mubr.bf16.gmra.mrb[8].mxu1 %v2749_v57  ;;  %v2813_v46 = vld [vmem:[%s3140_s19 + $0x64] ss:$12 sps:$4 sm:$0xff]   ;;  %v2827_v57 = vld [vmem:[%s3140_s19 + $0x20] ss:$12 sps:$4 sm:$0xff]  }
  0x3c   : > { %2378 = vmatpush3.bf16.msra.mxu1 %v2740_v49  ;;  %671 = vmatprep.mubr.bf16.mxu0 %v2745_v54  ;;  %v2816_v49 = vld [vmem:[%s3140_s19 + $0x60] ss:$12 sps:$4 sm:$0xff]   ;;  %v2824_v54 = vld [vmem:[%s3110_s21 + $0x68] ss:$12 sps:$4 sm:$0xff]  }
  0x3d   : > { %2379 = vmatprep.subr.bf16.mxu1 %v2743_v52  ;;  %2444 = vmatpush3.bf16.msra.mxu0 %v2753_v61  ;;  %v2821_v52 = vld [vmem:[%s3110_s21 + $0x50] ss:$12 sps:$4 sm:$0xff]   ;;  %v2831_v61 = vld [vmem:[%s3140_s19 + $0x80] ss:$12 sps:$4 sm:$0xff]  }
  0x3e   : > { %2445 = vmatprep.subr.bf16.mxu0 %v2756_v0  ;;  %1049 = vmatprep.mubr.bf16.mxu1 %v2761_v3 }
  0x40   : > { %2380 = vmatpush3.bf16.msra.mxu1 %v2744_v53  ;;  %v2822_v53 = vld [vmem:[%s3140_s19 + $0x78] ss:$12 sps:$4 sm:$0xff]  }
  0x41   : > { %2381 = vmatprep.subr.bf16.mxu1 %v2750_v58  ;;  %2446 = vmatpush3.bf16.msra.mxu0 %v2762_v4  ;;  %v2828_v58 = vld [vmem:[%s3140_s19 + $0x38] ss:$12 sps:$4 sm:$0xff]  }
  0x42   : > { %2447 = vmatprep.subr.bf16.mxu0 %v2764_v6 }
  0x43   : > { %672 = vmatmul.mubr.bf16.gmra.mrb[12].mxu0 %v2748_v56  ;;  %v2826_v56 = vld [vmem:[%s3110_s21 + $0x80] ss:$12 sps:$4 sm:$0xff]   ;;  %s198_s21 = smul.u32 6, %s2854_s12  ;;  %s3392_s12 = smov (!%p211_p7, %s2854_s12), 1 }
  0x44   : > { %2382 = vmatpush3.bf16.msra.mxu1 %v2752_v60  ;;  %679 = vmatprep.mubr.bf16.mxu0 %v2757_v1  ;;  %v2830_v60 = vld [vmem:[%s3140_s19 + $0x68] ss:$12 sps:$4 sm:$0xff]   ;;  %s2646_s19 = smul.u32 24, %s3388_s13  ;;  %s214_s23 = sadd.s32 %s2000_s4, %s3392_s12 }
  0x45   : > { %2383 = vmatprep.subr.bf16.mxu1 %v2754_v62  ;;  %2448 = vmatpush3.bf16.msra.mxu0 %v2765_v7  ;;  %p201_p6 = scmp.lt.s32.totalorder %s198_s21, 11  ;;  %s2001_s24 = sshll.u32 %s214_s23, 3 }
  0x46   : > { %2449 = vmatprep.subr.bf16.mxu0 %v2772_v12  ;;  %s216_s27 = scalar_lea.vmem %s3374_s3, %s2001_s24 }
  0x48   : > { %2384 = vmatpush3.bf16.msra.mxu1 %v2755_v63 }
  0x49   : > { %2450 = vmatpush3.bf16.msra.mxu0 %v2773_v13  ;;  %2529 = vmatprep.subr.bf16.mxu1 %v2774_v14 }
  0x4a   : > { %2557 = vmatprep.subr.bf16.mxu0 %v2781_v17 }
  0x4b   : > { %1050 = vmatmul.mubr.bf16.vlgmr.msra.gmra.mrb[12].mxu1 %v2759_v2  ;;  %680 = vmatmul.mubr.bf16.gmra.mrb[16].mxu0 %v2763_v5 }
  0x4c   : > { %687 = vmatprep.mubr.bf16.mxu0 %v2766_v8  ;;  %1057 = vmatprep.mubr.bf16.mxu1 %v2768_v9 }
  0x4d   : > { %2530 = vmatpush3.bf16.msra.mxu1 %v2774_v14 }
  0x4e   : > { %2531 = vmatprep.subr.bf16.mxu1 %v2782_v19 }
  0x51   : > { %2532 = vmatpush3.bf16.msra.mxu1 %v2782_v19 }
  0x52   : > { %2533 = vmatprep.subr.bf16.mxu1 %v2789_v24 }
  0x53   : > { %1058 = vmatmul.mubr.bf16.gmra.mrb[16].mxu1 %v2771_v11  ;;  %688 = vmatmul.mubr.bf16.gmra.mrb[20].mxu0 %v2770_v10 }
  0x54   : > { %1065 = vmatprep.mubr.bf16.mxu1 %v2775_v15  ;;  %1530 = vmatprep.mubr.bf16.mxu0 %v2779_v16 }
  0x55   : > { %2534 = vmatpush3.bf16.msra.mxu1 %v2789_v24 }
  0x56   : > { %2535 = vmatprep.subr.bf16.mxu1 %v2791_v25 }
  0x59   : > { %2536 = vmatpush3.bf16.msra.mxu1 %v2791_v25 }
  0x5a   : > { %2537 = vmatprep.subr.bf16.mxu1 %v2798_v31 }
  0x5b   : > { %1066 = vmatmul.mubr.bf16.gmra.mrb[20].mxu1 %v2780_v20  ;;  %1531 = vmatmul.mubr.bf16.vlgmr.msra.gmra.mrb[24].mxu0 %v2777_v18 }
  0x5c   : > { %1073 = vmatprep.mubr.bf16.mxu1 %v2784_v21  ;;  %2558 = vmatpush3.bf16.msra.mxu0 %v2781_v17 }
  0x5d   : > { %1538 = vmatprep.mubr.bf16.mxu0 %v2786_v22  ;;  %2559 = vmatprep.subr.bf16.mxu0 %v2783_v23 }
  0x5e   : > { %2538 = vmatpush3.bf16.msra.mxu1 %v2798_v31 }
  0x5f   : > { %2539 = vmatprep.subr.bf16.mxu1 %v2801_v34 }
  0x60   : > { %2560 = vmatpush3.bf16.msra.mxu0 %v2783_v23 }
  0x61   : > { %2561 = vmatprep.subr.bf16.mxu0 %v2792_v26 }
  0x62   : > { %2540 = vmatpush3.bf16.msra.mxu1 %v2801_v34 }
  0x63   : > { %1074 = vmatmul.mubr.bf16.gmra.mrb[24].mxu1 %v2788_v27  ;;  %1539 = vmatmul.mubr.bf16.gmra.mrb[28].mxu0 %v2790_v28 }
  0x64   : > { %2562 = vmatpush3.bf16.msra.mxu0 %v2792_v26  ;;  %1081 = vmatprep.mubr.bf16.mxu1 %v2793_v29 }
  0x65   : > { %1546 = vmatprep.mubr.bf16.mxu0 %v2795_v30  ;;  %2563 = vmatprep.subr.bf16.mxu0 %v2800_v32 }
  0x66   : > { %2541 = vmatprep.subr.bf16.mxu1 %v2807_v39 }
  0x67   : > { %2542 = vmatpush3.bf16.msra.mxu1 %v2807_v39 }
  0x68   : > { %2564 = vmatpush3.bf16.msra.mxu0 %v2800_v32  ;;  %2543 = vmatprep.subr.bf16.mxu1 %v2810_v41 }
  0x69   : > { %2565 = vmatprep.subr.bf16.mxu0 %v2809_v36 }
  0x6b   : > { %1082 = vmatmul.mubr.bf16.gmra.mrb[28].mxu1 %v2797_v33  ;;  %1547 = vmatmul.mubr.bf16.gmra.mrb[32].mxu0 %v2799_v35 }
  0x6c   : > { %1089 = vmatprep.mubr.bf16.mxu1 %v2802_v37  ;;  %1554 = vmatprep.mubr.bf16.mxu0 %v2804_v38 }
  0x6d   : > { %2566 = vmatpush3.bf16.msra.mxu0 %v2809_v36  ;;  %2544 = vmatpush3.bf16.msra.mxu1 %v2810_v41 }
  0x6e   : > { %2567 = vmatprep.subr.bf16.mxu0 %v2811_v40 }
  0x71   : > { %2568 = vmatpush3.bf16.msra.mxu0 %v2811_v40 }
  0x72   : > { %2569 = vmatprep.subr.bf16.mxu0 %v2817_v43 }
  0x73   : > { %1090 = vmatmul.mubr.bf16.gmra.mrb[32].mxu1 %v2806_v42  ;;  %1555 = vmatmul.mubr.bf16.gmra.mrb[36].mxu0 %v2808_v44 }
  0x74   : > { %2545 = vmatprep.mubr.bf16.mxu1 %v2812_v45  ;;  %1562 = vmatprep.mubr.bf16.mxu0 %v2813_v46 }
  0x75   : > { %2570 = vmatpush3.bf16.msra.mxu0 %v2817_v43 }
  0x76   : > { %2571 = vmatprep.subr.bf16.mxu0 %v2823_v47 }
  0x79   : > { %2572 = vmatpush3.bf16.msra.mxu0 %v2823_v47 }
  0x7b   : > { %2546 = vmatmul.mubr.bf16.vlgmr.msra.gmra.mrb[0].mxu1 %v2815_v48  ;;  %1563 = vmatmul.mubr.bf16.gmra.mrb[40].mxu0 %v2816_v49 }
  0x7c   : > { %2549 = vmatprep.mubr.bf16.mxu1 %v2818_v50  ;;  %1570 = vmatprep.mubr.bf16.mxu0 %v2819_v51 }
  0x83   : > { %2550 = vmatmul.mubr.bf16.gmra.mrb[4].mxu1 %v2821_v52  ;;  %1571 = vmatmul.mubr.bf16.gmra.mrb[44].mxu0 %v2822_v53 }
  0x84   : > { %2553 = vmatprep.mubr.bf16.mxu1 %v2824_v54  ;;  %2573 = vmatprep.mubr.bf16.mxu0 %v2825_v55 }
  0x8b   : > { %2554 = vmatmul.mubr.bf16.gmra.mrb[8].mxu1 %v2826_v56  ;;  %2574 = vmatmul.mubr.bf16.vlgmr.msra.gmra.mrb[48].mxu0 %v2827_v57 }
  0x8c   : > { %2577 = vmatprep.mubr.bf16.mxu0 %v2828_v58 }
  0x93   : > { %2578 = vmatmul.mubr.bf16.gmra.mrb[52].mxu0 %v2829_v59 }
  0x94   : > { %2581 = vmatprep.mubr.bf16.mxu0 %v2830_v60 }
  0x9b   : > { %2582 = vmatmul.mubr.bf16.gmra.mrb[56].mxu0 %v2831_v61 }
  0xfe   : > { %v2319_v62 = vpop.f32.mrb[0].mxu0 }
  0xff   : > { %v2320_v63 = vpop.f32.mrb[1].mxu0 }
 0x100   : > { %v2321_v0 = vadd.f32 %v2320_v63, %v2319_v62  ;;  %v2322_v1 = vpop.f32.mrb[2].mxu0 }
 0x101   : > { %v2323_v2 = vpop.f32.mrb[3].mxu0 }
 0x102   : > { %v2324_v3 = vadd.f32 %v2323_v2, %v2322_v1 }
 0x106   : > { %v2325_v4 = vpop.f32.mrb[4].mxu0 }
 0x107   : > { %v2326_v5 = vpop.f32.mrb[5].mxu0 }
 0x108   : > { %v2327_v6 = vadd.f32 %v2326_v5, %v2325_v4  ;;  %v2328_v7 = vpop.f32.mrb[6].mxu0 }
 0x109   : > { %v2329_v8 = vpop.f32.mrb[7].mxu0 }
 0x10a   : > { %v2330_v9 = vadd.f32 %v2329_v8, %v2328_v7 }
 0x10e   : > { %v2331_v10 = vpop.f32.mrb[8].mxu0 }
 0x10f   : > { %v2332_v11 = vpop.f32.mrb[9].mxu0 }
 0x110   : > { %v2333_v12 = vadd.f32 %v2332_v11, %v2331_v10  ;;  %v2334_v13 = vpop.f32.mrb[10].mxu0 }
 0x111   : > { %v2335_v14 = vpop.f32.mrb[11].mxu0 }
 0x112   : > { %v2336_v15 = vadd.f32 %v2335_v14, %v2334_v13 }
 0x116   : > { %v2337_v16 = vpop.f32.mrb[12].mxu0 }
 0x117   : > { %v2338_v17 = vpop.f32.mrb[13].mxu0 }
 0x118   : > { %v2339_v18 = vadd.f32 %v2338_v17, %v2337_v16  ;;  %v2340_v19 = vpop.f32.mrb[14].mxu0 }
 0x119   : > { %v2341_v20 = vpop.f32.mrb[15].mxu0 }
 0x11a   : > { %v2342_v21 = vadd.f32 %v2341_v20, %v2340_v19 }
 0x11e   : > { %v2385_v22 = vpop.f32.mrb[12].mxu1  ;;  %v2343_v23 = vpop.f32.mrb[16].mxu0 }
 0x11f   : > { %v2386_v24 = vpop.f32.mrb[13].mxu1  ;;  %v2344_v25 = vpop.f32.mrb[17].mxu0 }
 0x120   : > { %v2387_v26 = vadd.f32 %v2386_v24, %v2385_v22  ;;  %v2388_v27 = vpop.f32.mrb[14].mxu1  ;;  %v2345_v28 = vadd.f32 %v2344_v25, %v2343_v23  ;;  %v2346_v29 = vpop.f32.mrb[18].mxu0 }
 0x121   : > { %v2389_v30 = vpop.f32.mrb[15].mxu1  ;;  %v2347_v31 = vpop.f32.mrb[19].mxu0 }
 0x122   : > { %v2390_v32 = vadd.f32 %v2389_v30, %v2388_v27  ;;  %v3222_v33 = vadd.f32 %v2387_v26, %v2321_v0  ;;  %v2348_v34 = vadd.f32 %v2347_v31, %v2346_v29 }
 0x124   : > { %v3224_v35 = vadd.f32 %v2390_v32, %v2324_v3 }
 0x126   : > { %v2391_v36 = vpop.f32.mrb[16].mxu1  ;;  %v2349_v37 = vpop.f32.mrb[20].mxu0 }
 0x127   : > { %v2392_v38 = vpop.f32.mrb[17].mxu1  ;;  %v2350_v39 = vpop.f32.mrb[21].mxu0 }
 0x128   : > { %v2393_v40 = vadd.f32 %v2392_v38, %v2391_v36  ;;  %v2394_v41 = vpop.f32.mrb[18].mxu1  ;;  %v2351_v42 = vadd.f32 %v2350_v39, %v2349_v37  ;;  %v2352_v43 = vpop.f32.mrb[22].mxu0 }
 0x129   : > { %v2395_v44 = vpop.f32.mrb[19].mxu1  ;;  %v2353_v45 = vpop.f32.mrb[23].mxu0 }
 0x12a   : > { %v2396_v46 = vadd.f32 %v2395_v44, %v2394_v41  ;;  %v2585_v47 = vadd.f32 %v2393_v40, %v2327_v6  ;;  %v2354_v48 = vadd.f32 %v2353_v45, %v2352_v43 }
 0x12c   : > { %v3226_v49 = vadd.f32 %v2396_v46, %v2330_v9 }
 0x12e   : > { %v2397_v50 = vpop.f32.mrb[20].mxu1  ;;  %v2451_v51 = vpop.f32.mrb[24].mxu0 }
 0x12f   : > { %v2398_v52 = vpop.f32.mrb[21].mxu1  ;;  %v2452_v54 = vpop.f32.mrb[25].mxu0 }
 0x130   : > { %v2399_v53 = vadd.f32 %v2398_v52, %v2397_v50  ;;  %v2400_v55 = vpop.f32.mrb[22].mxu1  ;;  %v3228_v56 = vadd.f32 %v2452_v54, %v2451_v51  ;;  %v2454_v57 = vpop.f32.mrb[26].mxu0 }
 0x131   : > { %v2401_v58 = vpop.f32.mrb[23].mxu1  ;;  %v2455_v60 = vpop.f32.mrb[27].mxu0 }
 0x132   : > { %v2402_v59 = vadd.f32 %v2401_v58, %v2400_v55  ;;  %v3230_v61 = vadd.f32 %v2399_v53, %v2333_v12  ;;  %v3232_v62 = vadd.f32 %v2455_v60, %v2454_v57 }
 0x134   : > { %v3234_v63 = vadd.f32 %v2402_v59, %v2336_v15 }
 0x136   : > { %v2403_v0 = vpop.f32.mrb[24].mxu1  ;;  %v2457_v1 = vpop.f32.mrb[28].mxu0 }
 0x137   : > { %v2404_v2 = vpop.f32.mrb[25].mxu1  ;;  %v2458_v4 = vpop.f32.mrb[29].mxu0 }
 0x138   : > { %v2405_v3 = vadd.f32 %v2404_v2, %v2403_v0  ;;  %v2406_v5 = vpop.f32.mrb[26].mxu1  ;;  %v2459_v6 = vadd.f32 %v2458_v4, %v2457_v1  ;;  %v2460_v7 = vpop.f32.mrb[30].mxu0  ;;  %v3258_v4 = vstv %s198_s21  ;;  %s3390_s21 = smov (!%p201_p6, %s198_s21), 11 }
 0x139   : > { %v2407_v8 = vpop.f32.mrb[27].mxu1  ;;  %v2461_v10 = vpop.f32.mrb[31].mxu0  ;;  %vm1744_vm0 = vcmp.lt.s32.totalorder %v3258_v4, 12  ;;  %s1998_s7 = sshll.u32 %s3390_s21, 1 }
 0x13a   : > { %v2408_v9 = vadd.f32 %v2407_v8, %v2406_v5  ;;  %v2601_v11 = vadd.f32 %v2405_v3, %v2339_v18  ;;  %v2462_v13 = vadd.f32 %v2461_v10, %v2460_v7  ;;  %v1737_v10 = vadd.s32 1, %v3258_v4  ;;  %s3275_s8 = sadd.s32 %s2646_s19, %s1998_s7 }
 0x13b   : > { %s1999_s9 = sshll.u32 %s3275_s8, 2 }
 0x13c   : > { %v3236_v14 = vadd.f32 %v2408_v9, %v2342_v21  ;;  %vm1745_vm2 = vcmp.lt.s32.totalorder %v1737_v10, 12  ;;  %s3308_s22 = scalar_lea.vmem %s3373_s2, %s1999_s9 }
 0x13e   : > { %v2409_v12 = vpop.f32.mrb[28].mxu1  ;;  %v2463_v16 = vpop.f32.mrb[32].mxu0 }
 0x13f   : > { %v2410_v17 = vpop.f32.mrb[29].mxu1  ;;  %v2464_v19 = vpop.f32.mrb[33].mxu0 }
 0x140   : > { %v2411_v15 = vadd.f32 %v2410_v17, %v2409_v12  ;;  %v2412_v20 = vpop.f32.mrb[30].mxu1  ;;  %v3238_v22 = vadd.f32 %v2464_v19, %v2463_v16  ;;  %v2466_v23 = vpop.f32.mrb[34].mxu0 }
 0x141   : > { %v2413_v24 = vpop.f32.mrb[31].mxu1  ;;  %v2467_v26 = vpop.f32.mrb[35].mxu0 }
 0x142   : > { %v2414_v25 = vadd.f32 %v2413_v24, %v2412_v20  ;;  %v3240_v27 = vadd.f32 %v2411_v15, %v2345_v28  ;;  %v3242_v29 = vadd.f32 %v2467_v26, %v2466_v23  ;;  %v2872_v26 = vmov 0.0  }
 0x144   : > { %v3244_v18 = vadd.f32 %v2414_v25, %v2348_v34  ;;  %v1732_v34 = vlaneseq }
 0x146   : > { %v2415_v21 = vpop.f32.mrb[32].mxu1  ;;  %v2469_v30 = vpop.f32.mrb[36].mxu0 }
 0x147   : > { %v2416_v31 = vpop.f32.mrb[33].mxu1  ;;  %v2470_v36 = vpop.f32.mrb[37].mxu0 }
 0x148   : > { %v2417_v32 = vadd.f32 %v2416_v31, %v2415_v21  ;;  %v2418_v37 = vpop.f32.mrb[34].mxu1  ;;  %v2471_v38 = vadd.f32 %v2470_v36, %v2469_v30  ;;  %v2472_v39 = vpop.f32.mrb[38].mxu0  ;;  %v2239_v36 = vsel %vm1744_vm0, 1.0, %v2872_v26 }
 0x149   : > { %v2419_v40 = vpop.f32.mrb[35].mxu1  ;;  %v2473_v43 = vpop.f32.mrb[39].mxu0 }
 0x14a   : > { %v2420_v41 = vadd.f32 %v2419_v40, %v2418_v37  ;;  %v2617_v44 = vadd.f32 %v2417_v32, %v2351_v42  ;;  %v2474_v45 = vadd.f32 %v2473_v43, %v2472_v39  ;;  %v1739_v43 = vadd.s32 3, %v3258_v4 }
 0x14c   : > { %v3246_v28 = vadd.f32 %v2420_v41, %v2354_v48  ;;  %vm1747_vm6 = vcmp.lt.s32.totalorder %v1739_v43, 12 }
 0x14e   : > { %v2547_v46 = vpop.f32.mrb[0].mxu1  ;;  %v2475_v51 = vpop.f32.mrb[40].mxu0 }
 0x14f   : > { %v2586_v50 = vadd.f32 %v2585_v47, %v2547_v46  ;;  %v1132_v52 = vpop.f32.mrb[1].mxu1  ;;  %v2476_v54 = vpop.f32.mrb[41].mxu0  ;;  %v1733_v47 = vshrl.u32 %v1732_v34, 7 }
 0x150   : > { %v2590_v53 = vadd.f32 %v3222_v33, %v1132_v52  ;;  %v2548_v55 = vpop.f32.mrb[2].mxu1  ;;  %v3250_v57 = vadd.f32 %v2476_v54, %v2475_v51  ;;  %v2478_v59 = vpop.f32.mrb[42].mxu0 }
 0x151   : > { %v2594_v58 = vadd.f32 %v3226_v49, %v2548_v55  ;;  %v1135_v60 = vpop.f32.mrb[3].mxu1  ;;  %v2587_v42 = vadd.f32 %v2586_v50, %v2459_v6  ;;  %v2479_v0 = vpop.f32.mrb[43].mxu0  ;;  %v3260_v49 = vadd.s32 8, %v1733_v47 }
 0x152   : > { %v2598_v48 = vadd.f32 %v3224_v35, %v1135_v60  ;;  %v2591_v1 = vadd.f32 %v2590_v53, %v3228_v56  ;;  %v3255_v2 = vadd.f32 %v2479_v0, %v2478_v59  ;;  %v1740_v60 = vadd.s32 4, %v3258_v4 }
 0x153   : > { %v2595_v3 = vadd.f32 %v2594_v58, %v2462_v13  ;;  %vm1743_vm1 = vcmp.lt.s32.totalorder %v3260_v49, 12 }
 0x154   : > { %v2599_v33 = vadd.f32 %v2598_v48, %v3232_v62  ;;  %vm3281_vm3 = vmand %vm1743_vm1, %vm1744_vm0  ;;  %vm1748_vm9 = vcmp.lt.s32.totalorder %v1740_v60, 12 }
 0x155   : > { %vm1753_vm4 = vmand %vm1743_vm1, %vm1745_vm2 }
 0x156   : > { %v2551_v5 = vpop.f32.mrb[4].mxu1  ;;  %v2481_v7 = vpop.f32.mrb[44].mxu0  ;;  %vm1757_vm8 = vmand %vm1743_vm1, %vm1747_vm6 }
 0x157   : > { %v2602_v6 = vadd.f32 %v2601_v11, %v2551_v5  ;;  %v1148_v35 = vpop.f32.mrb[5].mxu1  ;;  %v2482_v56 = vpop.f32.mrb[45].mxu0  ;;  %vm1759_vm10 = vmand %vm1743_vm1, %vm1748_vm9 }
 0x158   : > { %v2606_v8 = vadd.f32 %v3230_v61, %v1148_v35  ;;  %v2552_v9 = vpop.f32.mrb[6].mxu1  ;;  %v2483_v12 = vadd.f32 %v2482_v56, %v2481_v7  ;;  %v2484_v62 = vpop.f32.mrb[46].mxu0 }
 0x159   : > { %v2610_v13 = vadd.f32 %v3236_v14, %v2552_v9  ;;  %v1151_v16 = vpop.f32.mrb[7].mxu1  ;;  %v2603_v17 = vadd.f32 %v2602_v6, %v2471_v38  ;;  %v2485_v19 = vpop.f32.mrb[47].mxu0  ;;  %v2240_v38 = vsel %vm3281_vm3, 1.0, %v2872_v26 }
 0x15a   : > { %v2614_v15 = vadd.f32 %v3234_v63, %v1151_v16  ;;  %v2607_v61 = vadd.f32 %v2606_v8, %v3238_v22  ;;  %v2486_v11 = vadd.f32 %v2485_v19, %v2484_v62  ;;  %v1738_v22 = vadd.s32 2, %v3258_v4 }
 0x15b   : > { %v3270_v20 = vadd.f32 %v2610_v13, %v2474_v45  ;;  %v1741_v13 = vadd.s32 5, %v3258_v4 }
 0x15c   : > { %v3273_v14 = vadd.f32 %v2614_v15, %v3242_v29  ;;  %v2241_v29 = vsel %vm1745_vm2, 1.0, %v2872_v26  ;;  %vm1746_vm5 = vcmp.lt.s32.totalorder %v1738_v22, 12 }
 0x15d   : > { %vm1755_vm7 = vmand %vm1743_vm1, %vm1746_vm5  ;;  %vm1749_vm11 = vcmp.lt.s32.totalorder %v1741_v13, 12 }
 0x15e   : > { %v2555_v23 = vpop.f32.mrb[8].mxu1  ;;  %v2575_v25 = vpop.f32.mrb[48].mxu0  ;;  %v2244_v5 = vsel %vm1755_vm7, 1.0, %v2872_v26  ;;  %vm1761_vm12 = vmand %vm1743_vm1, %vm1749_vm11 }
 0x15f   : > { %v2618_v24 = vadd.f32 %v2617_v44, %v2555_v23  ;;  %v1164_v21 = vpop.f32.mrb[9].mxu1  ;;  %v2588_v30 = vadd.f32 %v2587_v42, %v2575_v25  ;;  %v1613_v32 = vpop.f32.mrb[49].mxu0 }
 0x160   : > { %v2622_v31 = vadd.f32 %v3240_v27, %v1164_v21  ;;  %v2556_v37 = vpop.f32.mrb[10].mxu1  ;;  %v2592_v39 = vadd.f32 %v2591_v1, %v1613_v32  ;;  %v2576_v41 = vpop.f32.mrb[50].mxu0 }
 0x161   : > { %v2626_v40 = vadd.f32 %v3246_v28, %v2556_v37  ;;  %v1167_v27 = vpop.f32.mrb[11].mxu1  ;;  %v3301_v44 = vadd.f32 %v2618_v24, %v2483_v12  ;;  %v2596_v45 = vadd.f32 %v2595_v3, %v2576_v41  ;;  %v1616_v34 = vpop.f32.mrb[51].mxu0  ;;  %v2242_v28 = vsel %vm1753_vm4, 1.0, %v2872_v26 }
 0x162   : > { %v2630_v46 = vadd.f32 %v3244_v18, %v1167_v27  ;;  %v2623_v50 = vadd.f32 %v2622_v31, %v3250_v57  ;;  %v1786_v51 = vmul.f32 %v2592_v39, %v2239_v36  ;;  %v2600_v52 = vadd.f32 %v2599_v33, %v1616_v34 }
 0x163   : > { %v2627_v53 = vadd.f32 %v2626_v40, %v2486_v11  ;;  %v2276_v54 = vpack.c.bf16 %v2596_v45, %v2588_v30  ;;  %v1788_v18 = vmul.f32 %v2588_v30, %v2241_v29  ;;  %v1789_v57 = vmul.f32 %v2596_v45, %v2242_v28 }
 0x164   : > { %v3312_v55 = vadd.f32 %v2630_v46, %v3255_v2  ;;  %v2271_v58 = vpack.c.bf16 %v2600_v52, %v2592_v39  ;;  %v1787_v59 = vmul.f32 %v2600_v52, %v2240_v38  ;;  %v1815_v42 = vmul.f32 %v2592_v39, %v1786_v51 }
 0x165   : > { %2298 = vst [vmem:[%s3308_s22 + $0x8] sm:$0xff] %v2276_v54   ;;  %v2245_v2 = vsel %vm1747_vm6, 1.0, %v2872_v26  ;;  %v2243_v33 = vsel %vm1746_vm5, 1.0, %v2872_v26  ;;  %v1817_v6 = vmul.f32 %v2588_v30, %v1788_v18  ;;  %v1818_v9 = vmul.f32 %v2596_v45, %v1789_v57 }
 0x166   : > { %2272 = vst [vmem:[%s3308_s22] sm:$0xff] %v2271_v58   ;;  %v1798_v48 = vadd.f32 %v1787_v59, %v1786_v51  ;;  %v1816_v0 = vmul.f32 %v2600_v52, %v1787_v59  ;;  %v2579_v1 = vpop.f32.mrb[52].mxu0  ;;  %v2248_v38 = vsel %vm1759_vm10, 1.0, %v2872_v26  ;;  %v2249_v45 = vsel %vm1749_vm11, 1.0, %v2872_v26 }
 0x167   : > { %v2604_v47 = vadd.f32 %v2603_v17, %v2579_v1  ;;  %v1629_v3 = vpop.f32.mrb[53].mxu0 }
 0x168   : > { %v1799_v7 = vadd.f32 %v1798_v48, %v1788_v18  ;;  %v1827_v35 = vadd.f32 %v1816_v0, %v1815_v42  ;;  %v2608_v8 = vadd.f32 %v2607_v61, %v1629_v3  ;;  %v2580_v56 = vpop.f32.mrb[54].mxu0  ;;  %v2246_v61 = vsel %vm1757_vm8, 1.0, %v2872_v26 }
 0x169   : > { %v2612_v10 = vadd.f32 %v3270_v20, %v2580_v56  ;;  %v1632_v12 = vpop.f32.mrb[55].mxu0  ;;  %v1792_v24 = vmul.f32 %v2604_v47, %v2245_v2 }
 0x16a   : > { %v1828_v62 = vadd.f32 %v1827_v35, %v1817_v6  ;;  %v1790_v16 = vmul.f32 %v2608_v8, %v2243_v33  ;;  %v1800_v17 = vadd.f32 %v1799_v7, %v1789_v57  ;;  %v2616_v15 = vadd.f32 %v3273_v14, %v1632_v12 }
 0x16b   : > { %v2286_v19 = vpack.c.bf16 %v2612_v10, %v2604_v47  ;;  %v2247_v14 = vsel %vm1748_vm9, 1.0, %v2872_v26  ;;  %v1793_v29 = vmul.f32 %v2612_v10, %v2246_v61  ;;  %v1821_v39 = vmul.f32 %v2604_v47, %v1792_v24 }
 0x16c   : > { %v1801_v11 = vadd.f32 %v1800_v17, %v1790_v16  ;;  %v1819_v63 = vmul.f32 %v2608_v8, %v1790_v16  ;;  %v1829_v23 = vadd.f32 %v1828_v62, %v1818_v9  ;;  %v2281_v22 = vpack.c.bf16 %v2616_v15, %v2608_v8 }
 0x16d   : > { %2300 = vst [vmem:[%s3308_s22 + $0x18] sm:$0xff] %v2286_v19   ;;  %v1791_v20 = vmul.f32 %v2616_v15, %v2244_v5  ;;  %v1822_v34 = vmul.f32 %v2612_v10, %v1793_v29 }
 0x16e   : > { %v1830_v4 = vadd.f32 %v1829_v23, %v1819_v63  ;;  %2299 = vst [vmem:[%s3308_s22 + $0x10] sm:$0xff] %v2281_v22   ;;  %v2583_v25 = vpop.f32.mrb[56].mxu0 }
 0x16f   : > { %v1802_v21 = vadd.f32 %v1801_v11, %v1791_v20  ;;  %v1820_v30 = vmul.f32 %v2616_v15, %v1791_v20  ;;  %v2620_v31 = vadd.f32 %v3301_v44, %v2583_v25  ;;  %v1645_v32 = vpop.f32.mrb[57].mxu0 }
 0x170   : > { %v2624_v36 = vadd.f32 %v2623_v50, %v1645_v32  ;;  %v2584_v37 = vpop.f32.mrb[58].mxu0 }
 0x171   : > { %v1803_v40 = vadd.f32 %v1802_v21, %v1792_v24  ;;  %v1831_v41 = vadd.f32 %v1830_v4, %v1820_v30  ;;  %v2628_v27 = vadd.f32 %v2627_v53, %v2584_v37  ;;  %v1648_v43 = vpop.f32.mrb[59].mxu0  ;;  %v2250_v53 = vsel %vm1761_vm12, 1.0, %v2872_v26 }
 0x172   : > { %v1794_v44 = vmul.f32 %v2624_v36, %v2247_v14  ;;  %v2632_v46 = vadd.f32 %v3312_v55, %v1648_v43  ;;  %v1796_v49 = vmul.f32 %v2620_v31, %v2249_v45 }
 0x173   : > { %v1832_v50 = vadd.f32 %v1831_v41, %v1821_v39  ;;  %v1804_v51 = vadd.f32 %v1803_v40, %v1793_v29  ;;  %v2296_v28 = vpack.c.bf16 %v2628_v27, %v2620_v31  ;;  %v1797_v55 = vmul.f32 %v2628_v27, %v2250_v53 }
 0x174   : > { %v1823_v52 = vmul.f32 %v2624_v36, %v1794_v44  ;;  %v2291_v54 = vpack.c.bf16 %v2632_v46, %v2624_v36  ;;  %v1795_v18 = vmul.f32 %v2632_v46, %v2248_v38  ;;  %v1825_v48 = vmul.f32 %v2620_v31, %v1796_v49 }
 0x175   : > { %v1805_v58 = vadd.f32 %v1804_v51, %v1794_v44  ;;  %v1833_v59 = vadd.f32 %v1832_v50, %v1822_v34  ;;  %2302 = vst [vmem:[%s3308_s22 + $0x28] sm:$0xff] %v2296_v28   ;;  %v1826_v47 = vmul.f32 %v2628_v27, %v1797_v55 }
 0x176   : > { %2301 = vst [vmem:[%s3308_s22 + $0x20] sm:$0xff] %v2291_v54   ;;  %v1824_v57 = vmul.f32 %v2632_v46, %v1795_v18 }
 0x177   : > { %v1834_v60 = vadd.f32 %v1833_v59, %v1823_v52  ;;  %v1806_v42 = vadd.f32 %v1805_v58, %v1795_v18 }
 0x179   : > { %v1807_v0 = vadd.f32 %v1806_v42, %v1796_v49  ;;  %v1835_v1 = vadd.f32 %v1834_v60, %v1824_v57 }
 0x17b   : > { %v1808_v2 = vadd.f32 %v1807_v0, %v1797_v55  ;;  %v1836_v26 = vadd.f32 %v1835_v1, %v1825_v48 }
 0x17d   : > { %v1809_v3 = vrot.slane %v1808_v2, 4  ;;  %v1837_v33 = vadd.f32 %v1836_v26, %v1826_v47 }
 0x17f   : > { %v1810_v5 = vadd.f32 %v1809_v3, %v1808_v2  ;;  %v1838_v6 = vrot.slane %v1837_v33, 4 }
 0x181   : > { %v1811_v7 = vrot.slane %v1810_v5, 2  ;;  %v1839_v35 = vadd.f32 %v1838_v6, %v1837_v33 }
 0x183   : > { %v1812_v8 = vadd.f32 %v1811_v7, %v1810_v5  ;;  %v1840_v56 = vrot.slane %v1839_v35, 2 }
 0x185   : > { %v1813_v9 = vrot.slane %v1812_v8, 1  ;;  %v1841_v10 = vadd.f32 %v1840_v56, %v1839_v35 }
 0x187   : > { %v1842_v12 = vrot.slane %v1841_v10, 1  ;;  %v1814_v13 = vadd.f32 %v1813_v9, %v1812_v8 }
 0x189   : > { %v1843_v62 = vadd.f32 %v1842_v12, %v1841_v10 }
 0x18b   : > { %v1845_v16 = vsel %vm1844_vm13, %v1814_v13, %v1843_v62 }
 0x18c   : > { %v1847_v17 = vsel %vm1846_vm14, %v1845_v16, 0.0 }
 0x18d   : > { %1848 = vst [vmem:[%s216_s27] sm:$0xff] %v1847_v17 }
 0x18e PF: > { %s14_s16 = sadd.s32 1, %s2870_s16   ;;  %s3377_s12 = smov %s2862_s14 }
 0x18f   : > { %p11_p8 = scmp.ge.s32.totalorder %s14_s16, 6   ;;  %s3378_s13 = smov %s2866_s15 }
 0x190   : > { %s3379_s14 = smov %s3382_s17  ;;  %s3380_s15 = smov %s3386_s18 }
 0x191   :  { %13 = sbr.rel (!%p11_p8) target bundleno = 3 (0x3), region = 75 }

</bundles_post_ra>
